<compile_context>
chip_gen: v7x
topology: tpu7x:2x2x1
jax: 0.10.0
libtpu: 0.0.40
codegen_flags: <defaults>
</compile_context>

<pallas_src>
import functools

import jax
import jax.numpy as jnp
from jax import lax
from jax.experimental import pallas as pl
from jax.experimental.pallas import tpu as pltpu


def _round_up(x, m):
    return ((x + m - 1) // m) * m


def _node_to_edge_attention_kernel(
    inc_ref,   # (n, tile_e)         streamed incidence block (original layout)
    h_ref,     # (n, hidden)         resident, precomputed node transform
    we_ref,    # (hidden, out_total) resident: [We (lane-padded) | wa | 0...]
    be_ref,    # (1, out_pad) f32    resident
    ba_ref,    # (1,) f32            SMEM scalar (attention bias)
    out_ref,   # (e_pad, out_pad) f32  resident output (revisited each step)
    s_ref,     # (e_pad, 128) f32    VMEM scratch: raw attention scores, lane 0
    *,
    num_valid_edges,
    out_pad,
):
    e = pl.program_id(0)
    tile_e = inc_ref.shape[1]
    e_pad = out_ref.shape[0]
    row0 = pl.multiple_of(e * tile_e, tile_e)

    # masked_node_features tile:  m = inc_block^T @ h   -> (tile_e, hidden)
    # (contract dim 0 of both operands; no relayout of the streamed block).
    m = lax.dot_general(
        inc_ref[...], h_ref[...],
        dimension_numbers=(((0,), (0,)), ((), ())),
        preferred_element_type=jnp.float32)

    # (coeff * m) @ We == coeff * (m @ We): store the unscaled projection now
    # and apply the softmax coefficient (and bias) in the epilogue.  The
    # attention row wa rides along as lane column `out_pad` of we_ref, so the
    # raw score falls out of the same MXU call.
    u = jnp.dot(m.astype(we_ref.dtype), we_ref[...],
                preferred_element_type=jnp.float32)
    out_ref[pl.ds(row0, tile_e), :] = u[:, :out_pad]      # 128-aligned slices,
    s_ref[pl.ds(row0, tile_e), :] = u[:, out_pad:]        # unmasked stores

    # Epilogue on the last edge tile: softmax over the edge axis, bias,
    # column-wise min-max normalization.  All f32 (v5e-safe).
    @pl.when(e == pl.num_programs(0) - 1)
    def _():
        s = s_ref[:, 0:1] + ba_ref[0]                      # (e_pad, 1)
        s = jnp.where(s > 0, s, 0.2 * s)                   # LeakyReLU(0.2)

        padded = num_valid_edges < e_pad                   # static Python bool
        if padded:
            valid = (lax.broadcasted_iota(jnp.int32, (e_pad, 1), 0)
                     < num_valid_edges)
            s = jnp.where(valid, s, -jnp.inf)

        s_max = jnp.max(s, axis=0, keepdims=True)
        p = jnp.exp(s - s_max)
        coeffs = p / jnp.sum(p, axis=0, keepdims=True)     # exact divide (once)

        y = coeffs * out_ref[...] + be_ref[...]
        if padded:
            # Padded rows (garbage from the ragged incidence tile) are replaced
            # by valid row 0: neutral for min/max, keeps NaN/Inf out, single
            # select instead of two +/-inf masked temporaries.
            y = jnp.where(valid, y, y[0:1, :])

        mn = jnp.min(y, axis=0, keepdims=True)
        mx = jnp.max(y, axis=0, keepdims=True)
        # TODO(synk): utils.min_max_normalize_cuda source unavailable; using
        # conventional per-column (x - min) / (max - min + eps).
        out_ref[...] = (y - mn) / (mx - mn + jnp.float32(1e-6))


def node_to_edge_attention(node_features, incidence_matrix, params, *,
                           tile_e=512, compute_dtype=jnp.bfloat16):
    """Fused NodeToEdgeAttention forward.

    node_features:    (n, node_dim) f32
    incidence_matrix: (n, num_edges) (binary)
    params: wn (node_dim,hidden), bn (hidden,), wa (hidden,1), ba (1,),
            we (hidden,output_dim), be (output_dim,)   [weights pre-transposed]
    returns: (num_edges, output_dim) f32
    """
    n, node_dim = node_features.shape
    num_edges = incidence_matrix.shape[1]
    hidden = params["wn"].shape[1]
    output_dim = params["we"].shape[1]

    out_pad = _round_up(output_dim, 128)      # lane-dense output slab
    out_total = out_pad + 128                 # +128 lanes carry the raw score
    # tile_e is the LANE dim of the streamed incidence block -> multiple of 128.
    tile_e = max(128, min(_round_up(tile_e, 128), _round_up(num_edges, 128)))
    num_tiles = pl.cdiv(num_edges, tile_e)
    e_pad = num_tiles * tile_e

    cd = jnp.dtype(compute_dtype)

    # node_transform is a tiny matmul: run it once in XLA (f32), cast the result.
    h = (node_features.astype(jnp.float32) @ params["wn"].astype(jnp.float32)
         + params["bn"].astype(jnp.float32)).astype(compute_dtype)

    # Incidence is streamed in its ORIGINAL (n, E) layout: no wrapper transpose
    # or pad materialization.  0/1 entries are exact in bf16.
    inc = incidence_matrix.astype(compute_dtype)

    # expand_output weight, lane-padded, with the attention weight folded in as
    # lane column `out_pad`.
    we_ext = jnp.zeros((hidden, out_total), compute_dtype)
    we_ext = we_ext.at[:, :output_dim].set(params["we"].astype(compute_dtype))
    we_ext = we_ext.at[:, out_pad].set(
        params["wa"].reshape(hidden).astype(compute_dtype))

    be = jnp.zeros((1, out_pad), jnp.float32)
    be = be.at[:, :output_dim].set(
        params["be"].reshape(1, output_dim).astype(jnp.float32))
    ba = params["ba"].reshape(1).astype(jnp.float32)

    kernel = functools.partial(_node_to_edge_attention_kernel,
                               num_valid_edges=num_edges, out_pad=out_pad)

    # VMEM footprint -> scoped limit (resident output + score scratch +
    # double-buffered incidence stream + resident weights), capped below v7x's
    # 64 MiB physical VMEM.
    n_sub = _round_up(n, 16)
    vmem_bytes = (
        e_pad * out_pad * 4
        + e_pad * 128 * 4
        + 2 * n_sub * tile_e * cd.itemsize
        + 2 * n_sub * _round_up(hidden, 128) * cd.itemsize
        + 2 * _round_up(hidden, 16) * out_total * cd.itemsize
        + 2 * 8 * out_pad * 4)
    vmem_limit = int(min(max(2 * vmem_bytes + (2 << 20), 32 << 20), 56 << 20))

    flops = 2 * e_pad * (n * hidden + hidden * out_total)
    bytes_accessed = int(
        inc.size * cd.itemsize + h.size * cd.itemsize
        + we_ext.size * cd.itemsize + (be.size + ba.size) * 4
        + 2 * e_pad * out_pad * 4)

    out = pl.pallas_call(
        kernel,
        out_shape=jax.ShapeDtypeStruct((e_pad, out_pad), jnp.float32),
        grid_spec=pltpu.PrefetchScalarGridSpec(
            num_scalar_prefetch=0,
            grid=(num_tiles,),
            in_specs=[
                pl.BlockSpec((n, tile_e), lambda e: (0, e)),          # streamed
                pl.BlockSpec((n, hidden), lambda e: (0, 0)),          # h resident
                pl.BlockSpec((hidden, out_total), lambda e: (0, 0)),  # [We | wa]
                pl.BlockSpec((1, out_pad), lambda e: (0, 0)),         # be
                pl.BlockSpec(memory_space=pltpu.MemorySpace.SMEM),    # ba scalar
            ],
            out_specs=pl.BlockSpec((e_pad, out_pad), lambda e: (0, 0)),
            scratch_shapes=[pltpu.VMEM((e_pad, 128), jnp.float32)],   # scores
        ),
        compiler_params=pltpu.CompilerParams(
            # Output slab + score scratch are carried (and read back) across the
            # edge axis -> it must stay "arbitrary".
            dimension_semantics=("arbitrary",),
            vmem_limit_bytes=vmem_limit,
        ),
        cost_estimate=pl.CostEstimate(
            flops=flops,
            transcendentals=e_pad,
            bytes_accessed=bytes_accessed,
        ),
    )(inc, h, we_ext, be, ba)

    return out[:num_edges, :output_dim]


def init_params(key, node_dim, hidden_dim, output_dim):
    """PyTorch-Linear-style init (uniform +-1/sqrt(fan_in)), weights stored
    pre-transposed as (in, out)."""
    k = jax.random.split(key, 6)

    def lin(kw, kb, fan_in, fan_out):
        bound = 1.0 / jnp.sqrt(fan_in)
        w = jax.random.uniform(kw, (fan_in, fan_out), jnp.float32, -bound, bound)
        b = jax.random.uniform(kb, (fan_out,), jnp.float32, -bound, bound)
        return w, b

    wn, bn = lin(k[0], k[1], node_dim, hidden_dim)     # node_transform
    wa, ba = lin(k[2], k[3], hidden_dim, 1)            # attention_weight
    we, be = lin(k[4], k[5], hidden_dim, output_dim)   # expand_output
    # NOTE: self.batch_norm is defined in __init__ but never used in forward().
    return {"wn": wn, "bn": bn, "wa": wa, "ba": ba, "we": we, "be": be}


def reference_forward(node_features, incidence_matrix, params, *,
                      compute_dtype=jnp.float32, eps=1e-6):
    """Pure-JAX reference, mimicking the kernel's cast points so the comparison
    isolates structural correctness (for compute_dtype=f32 it is the plain f32
    forward pass of the PyTorch module, with the same min-max eps)."""
    cdt = compute_dtype
    h = (node_features @ params["wn"] + params["bn"]).astype(cdt)
    inc = incidence_matrix.astype(cdt)
    m = jnp.dot(inc.T, h, preferred_element_type=jnp.float32)
    s = jnp.dot(m.astype(cdt), params["wa"].astype(cdt),
                preferred_element_type=jnp.float32) + params["ba"]
    s = jnp.where(s > 0, s, 0.2 * s)
    coeffs = jax.nn.softmax(s, axis=0)
    u = jnp.dot(m.astype(cdt), params["we"].astype(cdt),
                preferred_element_type=jnp.float32)
    y = coeffs * u + params["be"]
    mn = jnp.min(y, axis=0, keepdims=True)
    mx = jnp.max(y, axis=0, keepdims=True)
    return (y - mn) / (mx - mn + eps)


if __name__ == "__main__":
    key = jax.random.PRNGKey(0)
    k_nodes, k_inc, k_params = jax.random.split(key, 3)

    n, node_dim = 64, 32
    num_edges = 300
    hidden_dim = 32
    output_dim = 16

    node_features = jax.random.normal(k_nodes, (n, node_dim), jnp.float32)
    # binary incidence matrix (n, num_edges)
    incidence_matrix = (
        jax.random.uniform(k_inc, (n, num_edges), jnp.float32) < 0.25
    ).astype(jnp.float32)

    params = init_params(k_params, node_dim, hidden_dim, output_dim)

    # Run 1: default bf16 streaming, tile_e=128 -> 3 edge tiles with a ragged
    # last tile (300 edges padded to 384 internally, masked in the epilogue).
    out_bf16 = node_to_edge_attention(node_features, incidence_matrix, params,
                                      tile_e=128, compute_dtype=jnp.bfloat16)
    out_bf16 = jax.block_until_ready(out_bf16)
    ref_bf16 = reference_forward(node_features, incidence_matrix, params,
                                 compute_dtype=jnp.bfloat16)
    assert out_bf16.shape == (num_edges, output_dim)
    assert jnp.allclose(out_bf16, ref_bf16, atol=5e-3, rtol=5e-3), (
        f"bf16 mismatch vs reference: {jnp.max(jnp.abs(out_bf16 - ref_bf16))}")

    # Run 2: f32 path, 256 edges -> 2 full tiles (no-padding epilogue branch).
    inc_256 = incidence_matrix[:, :256]
    out_f32 = node_to_edge_attention(node_features, inc_256, params,
                                     tile_e=128, compute_dtype=jnp.float32)
    out_f32 = jax.block_until_ready(out_f32)
    ref_f32 = reference_forward(node_features, inc_256, params,
                                compute_dtype=jnp.float32)
    assert out_f32.shape == (256, output_dim)
    assert jnp.allclose(out_f32, ref_f32, atol=5e-3, rtol=5e-3), (
        f"f32 mismatch vs reference: {jnp.max(jnp.abs(out_f32 - ref_f32))}")

    print("KERNEL_OK")
</pallas_src>

<mosaic_0001>
module attributes {stable_mosaic.version = 11 : i64} {
  func.func @_node_to_edge_attention_kernel(%arg0: i32, %arg1: memref<64x128xbf16, #tpu.memory_space<vmem>>, %arg2: memref<64x32xbf16, #tpu.memory_space<vmem>>, %arg3: memref<32x256xbf16, #tpu.memory_space<vmem>>, %arg4: memref<1x128xf32, #tpu.memory_space<vmem>>, %arg5: memref<1xf32, #tpu.memory_space<smem>>, %arg6: memref<384x128xf32, #tpu.memory_space<vmem>>, %arg7: memref<384x128xf32, #tpu.memory_space<vmem>>) attributes {dimension_semantics = [#tpu.dimension_semantics<arbitrary>], iteration_bounds = array<i64: 3>, scalar_prefetch = 0 : i64, scratch_operands = 1 : i64, tpu.core_type = #tpu.core_type<tc>, window_params = [{transform_indices = @transform_0, window_bounds = array<i64: 64, 128>}, {pipeline_mode = #tpu.pipeline_mode<synchronous>, transform_indices = @transform_1, window_bounds = array<i64: 64, 32>}, {pipeline_mode = #tpu.pipeline_mode<synchronous>, transform_indices = @transform_2, window_bounds = array<i64: 32, 256>}, {pipeline_mode = #tpu.pipeline_mode<synchronous>, transform_indices = @transform_3, window_bounds = array<i64: 1, 128>}, {transform_indices = @transform_4, window_bounds = array<i64: 1>}, {pipeline_mode = #tpu.pipeline_mode<synchronous>, transform_indices = @transform_5, window_bounds = array<i64: 384, 128>}]} {
    %c128_i32 = arith.constant 128 : i32
    %0 = arith.muli %arg0, %c128_i32 : i32
    %1 = tpu.assume_multiple %0, 128 : i32
    %c0 = arith.constant 0 : index
    %c0_0 = arith.constant 0 : index
    %2 = vector.load %arg1[%c0, %c0_0] : memref<64x128xbf16, #tpu.memory_space<vmem>>, vector<64x128xbf16>
    %c0_1 = arith.constant 0 : index
    %c0_2 = arith.constant 0 : index
    %3 = vector.load %arg2[%c0_1, %c0_2] : memref<64x32xbf16, #tpu.memory_space<vmem>>, vector<64x32xbf16>
    %cst = arith.constant dense<0.000000e+00> : vector<128x32xf32>
    %4 = tpu.matmul %2, %3, %cst {dimension_numbers = #tpu.dot_dimension_numbers<[0], [0], [1], [1], [0, 1, 1, 1], [], []>} : vector<64x128xbf16>, vector<64x32xbf16>, vector<128x32xf32> -> vector<128x32xf32>
    %5 = arith.truncf %4 : vector<128x32xf32> to vector<128x32xbf16>
    %c0_3 = arith.constant 0 : index
    %c0_4 = arith.constant 0 : index
    %6 = vector.load %arg3[%c0_3, %c0_4] : memref<32x256xbf16, #tpu.memory_space<vmem>>, vector<32x256xbf16>
    %cst_5 = arith.constant dense<0.000000e+00> : vector<128x256xf32>
    %7 = tpu.matmul %5, %6, %cst_5 {dimension_numbers = #tpu.dot_dimension_numbers<[1], [0], [0], [1], [0, 0, 1, 1], [], []>} : vector<128x32xbf16>, vector<32x256xbf16>, vector<128x256xf32> -> vector<128x256xf32>
    %8 = vector.extract_strided_slice %7 {offsets = [0, 0], sizes = [128, 128], strides = [1, 1]} : vector<128x256xf32> to vector<128x128xf32>
    %9 = arith.index_cast %1 : i32 to index
    %c0_6 = arith.constant 0 : index
    %10 = vector.load %arg6[%9, %c0_6] : memref<384x128xf32, #tpu.memory_space<vmem>>, vector<128x128xf32>
    tpu.vector_store %arg6[%9, %c0_6], %8 {strides = array<i32>} : memref<384x128xf32, #tpu.memory_space<vmem>>, vector<128x128xf32>,
    %11 = vector.extract_strided_slice %7 {offsets = [0, 128], sizes = [128, 128], strides = [1, 1]} : vector<128x256xf32> to vector<128x128xf32>
    %12 = arith.index_cast %1 : i32 to index
    %c0_7 = arith.constant 0 : index
    %13 = vector.load %arg7[%12, %c0_7] : memref<384x128xf32, #tpu.memory_space<vmem>>, vector<128x128xf32>
    tpu.vector_store %arg7[%12, %c0_7], %11 {strides = array<i32>} : memref<384x128xf32, #tpu.memory_space<vmem>>, vector<128x128xf32>,
    %c2_i32 = arith.constant 2 : i32
    %14 = arith.cmpi eq, %arg0, %c2_i32 : i32
    %15 = arith.extui %14 : i1 to i32
    %c0_i32 = arith.constant 0 : i32
    %16 = arith.cmpi ne, %15, %c0_i32 : i32
    scf.if %16 {
      %c0_8 = arith.constant 0 : index
      %c0_9 = arith.constant 0 : index
      %17 = vector.load %arg7[%c0_8, %c0_9] : memref<384x128xf32, #tpu.memory_space<vmem>>, vector<384x1xf32>
      %c0_10 = arith.constant 0 : index
      %18 = memref.load %arg5[%c0_10] : memref<1xf32, #tpu.memory_space<smem>>
      %19 = vector.broadcast %18 : f32 to vector<384x1xf32>
      %20 = arith.addf %17, %19 : vector<384x1xf32>
      %cst_11 = arith.constant 0.000000e+00 : f32
      %21 = vector.broadcast %cst_11 : f32 to vector<384x1xf32>
      %22 = arith.cmpf ogt, %20, %21 : vector<384x1xf32>
      %cst_12 = arith.constant 2.000000e-01 : f32
      %23 = vector.broadcast %cst_12 : f32 to vector<384x1xf32>
      %24 = arith.mulf %23, %20 : vector<384x1xf32>
      %25 = arith.select %22, %20, %24 : vector<384x1xi1>, vector<384x1xf32>
      %26 = tpu.iota {dimensions = array<i32: 0>} : vector<384x1xi32>
      %c300_i32 = arith.constant 300 : i32
      %27 = vector.broadcast %c300_i32 : i32 to vector<384x1xi32>
      %28 = arith.cmpi slt, %26, %27 : vector<384x1xi32>
      %cst_13 = arith.constant 0xFF800000 : f32
      %29 = vector.broadcast %cst_13 : f32 to vector<384x1xf32>
      %30 = arith.select %28, %25, %29 : vector<384x1xi1>, vector<384x1xf32>
      %cst_14 = arith.constant dense<0xFF800000> : vector<1xf32>
      %31 = vector.multi_reduction <maximumf>, %30, %cst_14 [0] : vector<384x1xf32> to vector<1xf32>
      %32 = vector.shape_cast %31 : vector<1xf32> to vector<1x1xf32>
      %33 = vector.broadcast %32 : vector<1x1xf32> to vector<384x1xf32>
      %34 = arith.subf %30, %33 : vector<384x1xf32>
      %35 = math.exp %34 : vector<384x1xf32>
      %cst_15 = arith.constant dense<0.000000e+00> : vector<1xf32>
      %36 = vector.multi_reduction <add>, %35, %cst_15 [0] : vector<384x1xf32> to vector<1xf32>
      %37 = vector.shape_cast %36 : vector<1xf32> to vector<1x1xf32>
      %38 = vector.broadcast %37 : vector<1x1xf32> to vector<384x1xf32>
      %39 = arith.divf %35, %38 : vector<384x1xf32>
      %c0_16 = arith.constant 0 : index
      %c0_17 = arith.constant 0 : index
      %40 = vector.load %arg6[%c0_16, %c0_17] : memref<384x128xf32, #tpu.memory_space<vmem>>, vector<384x128xf32>
      %41 = vector.broadcast %39 : vector<384x1xf32> to vector<384x128xf32>
      %42 = arith.mulf %41, %40 : vector<384x128xf32>
      %c0_18 = arith.constant 0 : index
      %c0_19 = arith.constant 0 : index
      %43 = vector.load %arg4[%c0_18, %c0_19] : memref<1x128xf32, #tpu.memory_space<vmem>>, vector<1x128xf32>
      %44 = vector.broadcast %43 : vector<1x128xf32> to vector<384x128xf32>
      %45 = arith.addf %42, %44 : vector<384x128xf32>
      %46 = vector.extract_strided_slice %45 {offsets = [0, 0], sizes = [1, 128], strides = [1, 1]} : vector<384x128xf32> to vector<1x128xf32>
      %47 = vector.shape_cast %28 : vector<384x1xi1> to vector<384x1xi1>
      %48 = vector.broadcast %47 : vector<384x1xi1> to vector<384x128xi1>
      %49 = vector.shape_cast %46 : vector<1x128xf32> to vector<1x128xf32>
      %50 = vector.broadcast %49 : vector<1x128xf32> to vector<384x128xf32>
      %51 = arith.select %48, %45, %50 : vector<384x128xi1>, vector<384x128xf32>
      %cst_20 = arith.constant dense<0x7F800000> : vector<128xf32>
      %52 = vector.multi_reduction <minimumf>, %51, %cst_20 [0] : vector<384x128xf32> to vector<128xf32>
      %53 = vector.shape_cast %52 : vector<128xf32> to vector<1x128xf32>
      %cst_21 = arith.constant dense<0xFF800000> : vector<128xf32>
      %54 = vector.multi_reduction <maximumf>, %51, %cst_21 [0] : vector<384x128xf32> to vector<128xf32>
      %55 = vector.shape_cast %54 : vector<128xf32> to vector<1x128xf32>
      %56 = vector.broadcast %53 : vector<1x128xf32> to vector<384x128xf32>
      %57 = arith.subf %51, %56 : vector<384x128xf32>
      %58 = arith.subf %55, %53 : vector<1x128xf32>
      %cst_22 = arith.constant 9.99999997E-7 : f32
      %59 = vector.broadcast %cst_22 : f32 to vector<1x128xf32>
      %60 = arith.addf %58, %59 : vector<1x128xf32>
      %61 = vector.broadcast %60 : vector<1x128xf32> to vector<384x128xf32>
      %62 = arith.divf %57, %61 : vector<384x128xf32>
      %c0_23 = arith.constant 0 : index
      %c0_24 = arith.constant 0 : index
      %63 = vector.load %arg6[%c0_23, %c0_24] : memref<384x128xf32, #tpu.memory_space<vmem>>, vector<384x128xf32>
      tpu.vector_store %arg6[%c0_23, %c0_24], %62 {strides = array<i32>} : memref<384x128xf32, #tpu.memory_space<vmem>>, vector<384x128xf32>,
    } else {
    }
    return
  }
  func.func @transform_0(%arg0: i32) -> (i32, i32) {
    %c0_i32 = arith.constant 0 : i32
    %c0_i32_0 = arith.constant 0 : i32
    return %c0_i32, %arg0 : i32, i32
  }
  func.func @transform_1(%arg0: i32) -> (i32, i32) {
    %c0_i32 = arith.constant 0 : i32
    %c0_i32_0 = arith.constant 0 : i32
    %c0_i32_1 = arith.constant 0 : i32
    return %c0_i32, %c0_i32_0 : i32, i32
  }
  func.func @transform_2(%arg0: i32) -> (i32, i32) {
    %c0_i32 = arith.constant 0 : i32
    %c0_i32_0 = arith.constant 0 : i32
    %c0_i32_1 = arith.constant 0 : i32
    return %c0_i32, %c0_i32_0 : i32, i32
  }
  func.func @transform_3(%arg0: i32) -> (i32, i32) {
    %c0_i32 = arith.constant 0 : i32
    %c0_i32_0 = arith.constant 0 : i32
    %c0_i32_1 = arith.constant 0 : i32
    return %c0_i32, %c0_i32_0 : i32, i32
  }
  func.func @transform_4(%arg0: i32) -> i32 {
    %c0_i32 = arith.constant 0 : i32
    %c0_i32_0 = arith.constant 0 : i32
    return %c0_i32 : i32
  }
  func.func @transform_5(%arg0: i32) -> (i32, i32) {
    %c0_i32 = arith.constant 0 : i32
    %c0_i32_0 = arith.constant 0 : i32
    %c0_i32_1 = arith.constant 0 : i32
    return %c0_i32, %c0_i32_0 : i32, i32
  }
}

</mosaic_0001>

<bundles_post_ra>
// kernel: tpu_custom_call.1
= control target key start
LH: loop header
LB: loop body
LE: loop exit
PB: predicated region body
PF: predicated region fallthrough
CT: control target
= control target key end

     0   :  { %s4037_s0 = inlined_call_operand.hbm [shape: bf16[64,300], index: 0, kind: input, shape index: {}]   ;;  %s4038_s1 = inlined_call_operand.vmem [shape: bf16[64,32], index: 1, kind: input, shape index: {}]   ;;  %s4039_s2 = inlined_call_operand.vmem [shape: bf16[32,256], index: 2, kind: input, shape index: {}]   ;;  %s4040_s3 = inlined_call_operand.vmem [shape: f32[1,128], index: 3, kind: input, shape index: {}]   ;;  %s4041_s4 = inlined_call_operand.<no memory space> [shape: f32[1], index: 4, kind: input, shape index: {}]   ;;  %s4042_s5 = inlined_call_operand.hbm [shape: f32[384,128], index: 5, kind: output, shape index: {}]  }
   0x1   :  { %10 = sst [smem:[#allocation3]] %s4041_s4 }
   0x2   :  { %11 = vsyncpa [#allocation5], 0 }
   0x3   :  { %13 = vsyncpa [#allocation5 + $0x1], 0 }
   0x4   :  { %14 = vsyncpa [#allocation6], 0  ;;  %s2652_s20 = smov 0   ;;  %s2654_s21 = smov 0  }
   0x5   :  { %s2656_s22 = smov 0   ;;  %s2658_s23 = smov 0  }
   0x6 LB: > { %s2671_s4 = sadd.s32 4294967295, %s2608_s23   ;;  %s2674_s24 = sadd.s32 1, %s2608_s23   ;;  %s2608_s23 = sphi %s2658_s23, %s4102_s23   ;;  %s2604_s22 = sphi %s2656_s22, %s4101_s22   ;;  %s2600_s21 = sphi %s2654_s21, %s4100_s21   ;;  %s2596_s20 = sphi %s2652_s20, %s4099_s20  }
   0x7   : > { %s24_s25 = ssub.s32 %s2608_s23, %s2674_s24  ;;  %s27_s26 = sadd.s32 1, %s2604_s22 }
   0x8   : > { %p25_p0 = scmp.eq.s32.totalorder %s24_s25, 0  ;;  %p34_p1 = scmp.ne.s32.totalorder %s2604_s22, %s2600_s21 }
   0x9   : > { %p35_p2 = scmp.eq.s32.totalorder %s2608_s23, 0  ;;  %p40_p3 = scmp.ne.s32.totalorder %s2600_s21, %s2596_s20 }
   0xa   : > { %s2684_s27 = scalar_select %p25_p0, %s2604_s22, %s27_s26  }
   0xb   : > { %p36_p4 = por %p35_p2, %p34_p1  ;;  %p41_p5 = scmp.eq.s32.totalorder %s2671_s4, 0 }
   0xc   : > { %p2373_p6 = scmp.lt.s32.totalorder %s2608_s23, 3  ;;  %s181_s29 = sand.u32 1, %s2604_s22  }
   0xd   : > { %p2688_p7 = por %p41_p5, %p40_p3  ;;  %s2284_s30 = sshll.u32 %s181_s29, 5 }
   0xe   : > { %s2285_s6 = sshll.u32 %s2608_s23, 6  ;;  %s185_s10 = scalar_lea.vmem [#allocation4], %s2284_s30 }
   0xf   : > { %s2697_s9 = scalar_lea.hbm %s4037_s0, %s2285_s6  ;;  %s191_s11 = sshll.u32 %s185_s10, 4  ;;  %s2699_s11 = int_to_ptr.vmem [resolvable:$true] %s191_s11 }
  0x10   : > { %p2701_p8 = pnand %p2373_p6, %p36_p4  ;;  %s2705_s13 = scalar_lea.sflag [#allocation5], %s181_s29 }
  0x11   : > { %s2514_s14 = scalar_lea.hbm %s2697_s9, 512  ;;  %s2519_s17 = scalar_lea.hbm %s4037_s0, 1536 }
  0x12   : > { %p2515_p9 = scmp.ne.s32.totalorder %s2697_s9, %s2514_s14  ;;  %p2516_p10 = pneg %p2701_p8 }
  0x13   : > { %p2520_p13 = scmp.lt.u32.totalorder %s2697_s9, %s4037_s0  ;;  %p2521_p0 = scmp.lt.u32.totalorder %s2519_s17, %s2514_s14 }
  0x14   : > { %p2517_p11 = pnand %p2516_p10, %p2515_p9  ;;  %p2523_p2 = scmp.lt.u32.totalorder %s2514_s14, %s2697_s9 }
  0x15   : > { %p2522_p1 = por %p2521_p0, %p2520_p13 }
  0x16   : > { %p2518_p12 = pneg %p2517_p11 }
  0x17   : > { %p2524_p3 = por %p2523_p2, %p2522_p1 }
  0x19   : > { %p2525_p4 = pnand %p2524_p3, %p2518_p12 }
  0x1b   : > { %2528 = shalt.err (!%p2525_p4)
}
  0x1c   : > { %s2529_s20 = scalar_lea.vmem %s2699_s11, 512  ;;  %s2610_s25 = smov [#allocation4]  }
  0x1d   : > { %p2530_p5 = scmp.ne.s32.totalorder %s2699_s11, %s2529_s20  ;;  %s2534_s26 = sshll.u32 %s2610_s25, 4  ;;  %s2535_s26 = int_to_ptr.vmem [resolvable:$false] %s2534_s26 }
  0x1e   : > { %s2536_s29 = scalar_lea.vmem %s2535_s26, 1024  ;;  %p2537_p11 = scmp.lt.s32.totalorder %s2699_s11, %s2535_s26 }
  0x1f   : > { %p2532_p6 = pnand %p2530_p5, %p2516_p10  ;;  %p2538_p13 = scmp.lt.s32.totalorder %s2536_s29, %s2529_s20 }
  0x21   : > { %p2533_p9 = pneg %p2532_p6  ;;  %p2539_p0 = por %p2538_p13, %p2537_p11 }
  0x23   : > { %p2540_p1 = pnand %p2539_p0, %p2533_p9 }
  0x25   : > { %2543 = shalt.err (!%p2540_p1)
}
  0x26   : > { %s2611_s30 = smov 192   ;;  %s2612_s6 = smov 64  }
  0x27   : > { %s2613_s7 = smov 4   ;;  %p2286_p10 = scmp.ge.s32.totalorder %s2608_s23, 1 }
  0x28   : > { %2372 = dma.hbm_to_vmem [thread:$0]  (!%p2701_p8), %s2697_s9, 512, %s2699_s11, %s2705_s13, %s2611_s30, %s2612_s6, %s2613_s7  }
  0x29   : > { %p199_p12 = scmp.lt.s32.totalorder %s2608_s23, 4 }
  0x2b   : > { %p200_p2 = pnand %p2286_p10, %p199_p12 }
  0x2c   : > { %s205_s8 = sand.u32 (!%p200_p2), 1, %s2600_s21  }
  0x2d   : > { %203 = sbr.rel (%p200_p2) target bundleno = 1157 (0x485), region = 40  ;;  %s2287_s10 = sshll.u32 (!%p200_p2), %s205_s8, 5 }
  0x2e   : > { %s206_s14 = scalar_lea.sflag (!%p200_p2), [#allocation5], %s205_s8  ;;  %s209_s15 = scalar_lea.vmem (!%p200_p2), [#allocation4], %s2287_s10 }
  0x34   : > { %2587 = dma.done.wait (%p2688_p7), %s206_s14, 512  }
  0x35   : > { %2589 = vsyncadd (%p2688_p7), %s206_s14, 4294966784  ;;  %v2416_v0 = vld [vmem:[%s209_s15] sm:$0xff]   ;;  %v2417_v1 = vld [vmem:[%s209_s15 + $0x8] sm:$0xff]   ;;  %vm313_vm0 = vcmask 523264   ;;  %v2614_v20 = vmov 0   ;;  %vm467_vm1 = vcmask 261120  }
  0x36   : > { %273 = vxpose.xlu0.c.b16.start [1/4] (short) %v2416_v0, 128  ;;  %v2420_v2 = vld [vmem:[%s4038_s1] sm:$0xff]   ;;  %v2421_v3 = vld [vmem:[%s4038_s1 + $0x8] sm:$0xff]   ;;  %v2418_v4 = vld [vmem:[%s209_s15 + $0x10] sm:$0xff]   ;;  %534 = vmatprep.mubr.bf16.mxu1 %v2614_v20  ;;  %s2288_s7 = sshll.u32 %s2671_s4, 7  ;;  %p2317_p7 = scmp.ne.s32.totalorder %s2671_s4, 2 }
  0x37   : > { %2335 = vmatprep.subr.bf16.mxu0 %v2420_v2  ;;  %v2422_v5 = vld [vmem:[%s4038_s1 + $0x10] sm:$0xff]   ;;  %v2424_v6 = vld [vmem:[%s4039_s2 + $0x4] ss:$8 sps:$4 sm:$0xff]   ;;  %v2426_v7 = vld [vmem:[%s4039_s2] ss:$8 sps:$4 sm:$0xff]   ;;  %s2781_s8 = scalar_lea.vmem [#allocation7], %s2288_s7 }
  0x38   : > { %2336 = vmatpush3.bf16.msra.mxu0 %v2420_v2  ;;  %v2419_v8 = vld [vmem:[%s209_s15 + $0x18] sm:$0xff]   ;;  %2359 = vmatprep.subr.bf16.mxu1 %v2424_v6  ;;  %s2785_s10 = scalar_lea.vmem [#allocation2], %s2288_s7 }
  0x39   : > { %2337 = vmatprep.subr.bf16.mxu0 %v2421_v3  ;;  %2361 = vmatpush1.bf16.msra.mxu1 %v2426_v7  ;;  %v2423_v9 = vld [vmem:[%s4038_s1 + $0x18] sm:$0xff]  }
  0x3a   : > { %274 = vxpose.xlu0.c.b16.cont [2/4] (short) %v2417_v1, 128  ;;  %v2427_v18 = vld [vmem:[%s4039_s2 + $0x14] ss:$8 sps:$4 sm:$0xff]   ;;  %v2429_v19 = vld [vmem:[%s4039_s2 + $0x10] ss:$8 sps:$4 sm:$0xff]  }
  0x3b   : > { %2360 = vmatprep.subr.bf16.mxu1 %v2427_v18 }
  0x3c   : > { %2338 = vmatpush3.bf16.msra.mxu0 %v2421_v3 }
  0x3d   : > { %2339 = vmatprep.subr.bf16.mxu0 %v2422_v5  ;;  %2362 = vmatpush1.bf16.msra.mxu1 %v2429_v19 }
  0x3e   : > { %275 = vxpose.xlu0.c.b16.cont [3/4] (short) %v2418_v4, 128 }
  0x40   : > { %2340 = vmatpush3.bf16.msra.mxu0 %v2422_v5 }
  0x41   : > { %2341 = vmatprep.subr.bf16.mxu0 %v2423_v9 }
  0x42   : > { %276 = vxpose.xlu0.c.b16.end [4/4] (short) %v2419_v8, 128 }
  0x44   : > { %2342 = vmatpush3.bf16.msra.mxu0 %v2423_v9 }
  0x45   : > { %492 = vmatprep.subr.bf16.mxu0 %v2424_v6 }
  0x9c   : > { %v281_v10 = vpop.trf.xlu0 }
  0x9d   : > { %2343 = vmatprep.mubr.msk.bf16.mxu0 %vm313_vm0, %v281_v10 }
  0xa0   : > { %v282_v11 = vpop.trf.xlu0 }
  0xa1   : > { %2344 = vmatmul.mubr.msk.bf16.vlgmr.msra.gmra.mrb[0].mxu0 %vm313_vm0, %v282_v11 }
  0xa2   : > { %493 = vmatpush1.bf16.msra.mxu0 %v2426_v7 }
  0xa3   : > { %494 = vmatprep.subr.bf16.mxu0 %v2427_v18 }
  0xa4   : > { %v283_v12 = vpop.trf.xlu0 }
  0xa5   : > { %2347 = vmatprep.mubr.msk.bf16.mxu0 %vm313_vm0, %v283_v12 }
  0xa6   : > { %495 = vmatpush1.bf16.msra.mxu0 %v2429_v19 }
  0xa8   : > { %v284_v13 = vpop.trf.xlu0 }
  0xa9   : > { %2348 = vmatmul.mubr.msk.bf16.gmra.mrb[4].mxu0 %vm313_vm0, %v284_v13 }
  0xac   : > { %v285_v14 = vpop.trf.xlu0 }
  0xad   : > { %2351 = vmatprep.mubr.msk.bf16.mxu0 %vm313_vm0, %v285_v14 }
  0xb0   : > { %v286_v15 = vpop.trf.xlu0 }
  0xb1   : > { %2352 = vmatmul.mubr.msk.bf16.gmra.mrb[8].mxu0 %vm313_vm0, %v286_v15 }
  0xb4   : > { %v287_v16 = vpop.trf.xlu0 }
  0xb5   : > { %2355 = vmatprep.mubr.msk.bf16.mxu0 %vm313_vm0, %v287_v16 }
  0xb8   : > { %v288_v17 = vpop.trf.xlu0 }
  0xb9   : > { %2356 = vmatmul.mubr.msk.bf16.gmra.mrb[12].mxu0 %vm313_vm0, %v288_v17 }
  0xba   : > { %524 = vmatprep.mubr.bf16.mxu0 %v2614_v20 }
 0x174   : > { %v2345_v21 = vpop.f32.mrb[0].mxu0 }
 0x175   : > { %v372_v22 = vpop.f32.mrb[1].mxu0 }
 0x176   : > { %v2346_v23 = vpop.f32.mrb[2].mxu0 }
 0x177   : > { %v436_v24 = vpack.c.bf16 %v2346_v23, %v2345_v21  ;;  %v375_v25 = vpop.f32.mrb[3].mxu0 }
 0x178   : > { %v435_v26 = vpack.c.bf16 %v375_v25, %v372_v22 }
 0x179   : > { %2310 = vmatmul.mubr.msk.bf16.vlgmr.msra.gmra.mrb[0].mxu1 %vm467_vm1, %v436_v24 }
 0x17a   : > { %2309 = vmatmul.mubr.msk.bf16.vlgmr.msra.gmra.mrb[16].mxu0 %vm467_vm1, %v435_v26  ;;  %544 = vmatprep.mubr.bf16.mxu1 %v2614_v20 }
 0x17c   : > { %v2349_v27 = vpop.f32.mrb[4].mxu0 }
 0x17d   : > { %v388_v28 = vpop.f32.mrb[5].mxu0 }
 0x17e   : > { %v2350_v29 = vpop.f32.mrb[6].mxu0 }
 0x17f   : > { %v438_v30 = vpack.c.bf16 %v2350_v29, %v2349_v27  ;;  %v391_v31 = vpop.f32.mrb[7].mxu0 }
 0x180   : > { %v437_v32 = vpack.c.bf16 %v391_v31, %v388_v28 }
 0x182   : > { %2311 = vmatmul.mubr.msk.bf16.gmra.mrb[4].mxu1 %vm467_vm1, %v437_v32 }
 0x183   : > { %554 = vmatprep.mubr.bf16.mxu1 %v2614_v20 }
 0x184   : > { %v2353_v33 = vpop.f32.mrb[8].mxu0 }
 0x185   : > { %v404_v34 = vpop.f32.mrb[9].mxu0 }
 0x186   : > { %v2354_v35 = vpop.f32.mrb[10].mxu0 }
 0x187   : > { %v440_v36 = vpack.c.bf16 %v2354_v35, %v2353_v33  ;;  %v407_v37 = vpop.f32.mrb[11].mxu0 }
 0x188   : > { %v439_v38 = vpack.c.bf16 %v407_v37, %v404_v34 }
 0x18a   : > { %2312 = vmatmul.mubr.msk.bf16.gmra.mrb[8].mxu1 %vm467_vm1, %v438_v30 }
 0x18b   : > { %564 = vmatprep.mubr.bf16.mxu1 %v2614_v20 }
 0x18c   : > { %v2357_v39 = vpop.f32.mrb[12].mxu0 }
 0x18d   : > { %v420_v40 = vpop.f32.mrb[13].mxu0 }
 0x18e   : > { %v2358_v41 = vpop.f32.mrb[14].mxu0 }
 0x18f   : > { %v442_v42 = vpack.c.bf16 %v2358_v41, %v2357_v39  ;;  %v423_v43 = vpop.f32.mrb[15].mxu0 }
 0x190   : > { %v441_v44 = vpack.c.bf16 %v423_v43, %v420_v40 }
 0x192   : > { %2313 = vmatmul.mubr.msk.bf16.gmra.mrb[12].mxu1 %vm467_vm1, %v439_v38 }
 0x193   : > { %574 = vmatprep.mubr.bf16.mxu1 %v2614_v20 }
 0x19a   : > { %2314 = vmatmul.mubr.msk.bf16.gmra.mrb[16].mxu1 %vm467_vm1, %v440_v36 }
 0x19b   : > { %584 = vmatprep.mubr.bf16.mxu1 %v2614_v20 }
 0x1a2   : > { %2315 = vmatmul.mubr.msk.bf16.gmra.mrb[20].mxu1 %vm467_vm1, %v441_v44 }
 0x1a3   : > { %594 = vmatprep.mubr.bf16.mxu1 %v2614_v20 }
 0x1aa   : > { %2316 = vmatmul.mubr.msk.bf16.gmra.mrb[24].mxu1 %vm467_vm1, %v442_v42 }
 0x24c   : > { %v536_v45 = vpop.f32.mrb[0].mxu1 }
 0x24d   : > { %608 = vst [vmem:[%s2781_s8 + $0x10] sm:$0xff] %v536_v45  ;;  %v526_v46 = vpop.f32.mrb[16].mxu0  ;;  %v538_v47 = vpop.f32.mrb[1].mxu1 }
 0x24e   : > { %606 = vst [vmem:[%s2781_s8] sm:$0xff] %v526_v46  ;;  %625 = vst [vmem:[%s2785_s10 + $0x10] sm:$0xff] %v538_v47  ;;  %v528_v48 = vpop.f32.mrb[17].mxu0  ;;  %v540_v49 = vpop.f32.mrb[2].mxu1 }
 0x24f   : > { %623 = vst [vmem:[%s2785_s10] sm:$0xff] %v528_v48  ;;  %609 = vst [vmem:[%s2781_s8 + $0x18] sm:$0xff] %v540_v49  ;;  %v530_v50 = vpop.f32.mrb[18].mxu0  ;;  %v542_v51 = vpop.f32.mrb[3].mxu1 }
 0x250   : > { %607 = vst [vmem:[%s2781_s8 + $0x8] sm:$0xff] %v530_v50  ;;  %626 = vst [vmem:[%s2785_s10 + $0x18] sm:$0xff] %v542_v51  ;;  %v532_v52 = vpop.f32.mrb[19].mxu0 }
 0x251   : > { %624 = vst [vmem:[%s2785_s10 + $0x8] sm:$0xff] %v532_v52 }
 0x255   : > { %v546_v53 = vpop.f32.mrb[4].mxu1 }
 0x256   : > { %610 = vst [vmem:[%s2781_s8 + $0x20] sm:$0xff] %v546_v53  ;;  %v548_v54 = vpop.f32.mrb[5].mxu1 }
 0x257   : > { %627 = vst [vmem:[%s2785_s10 + $0x20] sm:$0xff] %v548_v54  ;;  %v550_v55 = vpop.f32.mrb[6].mxu1 }
 0x258   : > { %611 = vst [vmem:[%s2781_s8 + $0x28] sm:$0xff] %v550_v55  ;;  %v552_v56 = vpop.f32.mrb[7].mxu1 }
 0x259   : > { %628 = vst [vmem:[%s2785_s10 + $0x28] sm:$0xff] %v552_v56 }
 0x25d   : > { %v556_v57 = vpop.f32.mrb[8].mxu1 }
 0x25e   : > { %612 = vst [vmem:[%s2781_s8 + $0x30] sm:$0xff] %v556_v57  ;;  %v558_v58 = vpop.f32.mrb[9].mxu1 }
 0x25f   : > { %629 = vst [vmem:[%s2785_s10 + $0x30] sm:$0xff] %v558_v58  ;;  %v560_v59 = vpop.f32.mrb[10].mxu1 }
 0x260   : > { %613 = vst [vmem:[%s2781_s8 + $0x38] sm:$0xff] %v560_v59  ;;  %v562_v60 = vpop.f32.mrb[11].mxu1 }
 0x261   : > { %630 = vst [vmem:[%s2785_s10 + $0x38] sm:$0xff] %v562_v60 }
 0x265   : > { %v566_v61 = vpop.f32.mrb[12].mxu1 }
 0x266   : > { %614 = vst [vmem:[%s2781_s8 + $0x40] sm:$0xff] %v566_v61  ;;  %v568_v62 = vpop.f32.mrb[13].mxu1 }
 0x267   : > { %631 = vst [vmem:[%s2785_s10 + $0x40] sm:$0xff] %v568_v62  ;;  %v570_v63 = vpop.f32.mrb[14].mxu1 }
 0x268   : > { %615 = vst [vmem:[%s2781_s8 + $0x48] sm:$0xff] %v570_v63  ;;  %v572_v0 = vpop.f32.mrb[15].mxu1 }
 0x269   : > { %632 = vst [vmem:[%s2785_s10 + $0x48] sm:$0xff] %v572_v0 }
 0x26d   : > { %v576_v1 = vpop.f32.mrb[16].mxu1 }
 0x26e   : > { %616 = vst [vmem:[%s2781_s8 + $0x50] sm:$0xff] %v576_v1  ;;  %v578_v2 = vpop.f32.mrb[17].mxu1 }
 0x26f   : > { %633 = vst [vmem:[%s2785_s10 + $0x50] sm:$0xff] %v578_v2  ;;  %v580_v3 = vpop.f32.mrb[18].mxu1 }
 0x270   : > { %617 = vst [vmem:[%s2781_s8 + $0x58] sm:$0xff] %v580_v3  ;;  %v582_v4 = vpop.f32.mrb[19].mxu1 }
 0x271   : > { %634 = vst [vmem:[%s2785_s10 + $0x58] sm:$0xff] %v582_v4 }
 0x275   : > { %v586_v5 = vpop.f32.mrb[20].mxu1 }
 0x276   : > { %618 = vst [vmem:[%s2781_s8 + $0x60] sm:$0xff] %v586_v5  ;;  %v588_v6 = vpop.f32.mrb[21].mxu1 }
 0x277   : > { %635 = vst [vmem:[%s2785_s10 + $0x60] sm:$0xff] %v588_v6  ;;  %v590_v7 = vpop.f32.mrb[22].mxu1 }
 0x278   : > { %619 = vst [vmem:[%s2781_s8 + $0x68] sm:$0xff] %v590_v7  ;;  %v592_v8 = vpop.f32.mrb[23].mxu1 }
 0x279   : > { %636 = vst [vmem:[%s2785_s10 + $0x68] sm:$0xff] %v592_v8 }
 0x27b   : > { %642 = sbr.rel (%p2317_p7) target bundleno = 1131 (0x46b), region = 48 }
 0x27d   : > { %v596_v9 = vpop.f32.mrb[24].mxu1 }
 0x27e   : > { %620 = vst [vmem:[%s2781_s8 + $0x70] sm:$0xff] %v596_v9  ;;  %v598_v10 = vpop.f32.mrb[25].mxu1 }
 0x27f   : > { %637 = vst [vmem:[%s2785_s10 + $0x70] sm:$0xff] %v598_v10  ;;  %v600_v11 = vpop.f32.mrb[26].mxu1 }
 0x280   : > { %621 = vst [vmem:[%s2781_s8 + $0x78] sm:$0xff] %v600_v11  ;;  %v602_v12 = vpop.f32.mrb[27].mxu1 }
 0x281   : > { %638 = vst [vmem:[%s2785_s10 + $0x78] sm:$0xff] %v602_v12 }
 0x282   : > { %v2615_v13 = vmov 0   ;;  %s691_s14 = sld [smem:[#allocation3]]  ;;  %v885_v14 = vlaneseq }
 0x283   : > { %2431 = vset.pattern.permute.xlu1 %v2615_v13  ;;  %2430 = vset.pattern.permute.xlu0 %v2615_v13 }
 0x284   : > { %v2818_v20 = vshrl.u32 %v885_v14, 7 }
 0x286   : > { %4059 = vst [vmem:[#allocation10_spill] sm:$0xff] %v2818_v20  ;;  %v2826_v36 = vadd.s32 296, %v2818_v20 }
 0x288   : > { %v643_v15 = vld [vmem:[#allocation2] sm:$0xff]  ;;  %v644_v16 = vld [vmem:[#allocation2 + $0x8] sm:$0xff]  ;;  %v645_v17 = vld [vmem:[#allocation2 + $0x10] sm:$0xff]  ;;  %v2820_v25 = vstv %s691_s14  ;;  %4060 = vst [vmem:[#allocation11_spill] sm:$0xff] %v2826_v36 }
 0x289   : > { %v646_v18 = vld [vmem:[#allocation2 + $0x18] sm:$0xff]  ;;  %v647_v19 = vld [vmem:[#allocation2 + $0x20] sm:$0xff]  ;;  %v648_v21 = vld [vmem:[#allocation2 + $0x28] sm:$0xff]  ;;  %v2823_v35 = vadd.f32 %v2820_v25, %v643_v15  ;;  %v2829_v40 = vadd.f32 %v2820_v25, %v644_v16  ;;  %v2832_v41 = vadd.f32 %v2820_v25, %v645_v17 }
 0x28a   : > { %v649_v22 = vld [vmem:[#allocation2 + $0x30] sm:$0xff]  ;;  %v650_v23 = vld [vmem:[#allocation2 + $0x38] sm:$0xff]  ;;  %v651_v24 = vld [vmem:[#allocation2 + $0x40] sm:$0xff]  ;;  %v2835_v42 = vadd.f32 %v2820_v25, %v646_v18  ;;  %v2838_v43 = vadd.f32 %v2820_v25, %v647_v19  ;;  %v2841_v47 = vadd.f32 %v2820_v25, %v648_v21 }
 0x28b   : > { %v652_v26 = vld [vmem:[#allocation2 + $0x48] sm:$0xff]  ;;  %v653_v27 = vld [vmem:[#allocation2 + $0x50] sm:$0xff]  ;;  %v654_v28 = vld [vmem:[#allocation2 + $0x58] sm:$0xff]  ;;  %v2844_v48 = vadd.f32 %v2820_v25, %v649_v22  ;;  %v2847_v49 = vadd.f32 %v2820_v25, %v650_v23  ;;  %v2850_v50 = vadd.f32 %v2820_v25, %v651_v24  ;;  %vm741_vm2 = vcmp.gt.f32.partialorder %v2823_v35, 0.0 }
 0x28c   : > { %v655_v29 = vld [vmem:[#allocation2 + $0x60] sm:$0xff]  ;;  %v656_v30 = vld [vmem:[#allocation2 + $0x68] sm:$0xff]  ;;  %v657_v31 = vld [vmem:[#allocation2 + $0x70] sm:$0xff]  ;;  %v2853_v54 = vadd.f32 %v2820_v25, %v652_v26  ;;  %v2856_v55 = vadd.f32 %v2820_v25, %v653_v27  ;;  %v2859_v56 = vadd.f32 %v2820_v25, %v654_v28  ;;  %vm742_vm3 = vcmp.gt.f32.partialorder %v2829_v40, 0.0 }
 0x28d   : > { %v658_v32 = vld [vmem:[#allocation2 + $0x78] sm:$0xff]  ;;  %v659_v33 = vld [vmem:[#allocation2 + $0x80] sm:$0xff]  ;;  %v660_v34 = vld [vmem:[#allocation2 + $0x88] sm:$0xff]  ;;  %v2862_v57 = vadd.f32 %v2820_v25, %v655_v29  ;;  %v2865_v61 = vadd.f32 %v2820_v25, %v656_v30  ;;  %v2868_v62 = vadd.f32 %v2820_v25, %v657_v31  ;;  %vm743_vm4 = vcmp.gt.f32.partialorder %v2832_v41, 0.0 }
 0x28e   : > { %v661_v37 = vld [vmem:[#allocation2 + $0x90] sm:$0xff]  ;;  %v662_v38 = vld [vmem:[#allocation2 + $0x98] sm:$0xff]  ;;  %v663_v39 = vld [vmem:[#allocation2 + $0xa0] sm:$0xff]  ;;  %v2871_v63 = vadd.f32 %v2820_v25, %v658_v32  ;;  %v2874_v0 = vadd.f32 %v2820_v25, %v659_v33  ;;  %v2877_v4 = vadd.f32 %v2820_v25, %v660_v34  ;;  %vm744_vm5 = vcmp.gt.f32.partialorder %v2835_v42, 0.0 }
 0x28f   : > { %v664_v44 = vld [vmem:[#allocation2 + $0xa8] sm:$0xff]  ;;  %v665_v45 = vld [vmem:[#allocation2 + $0xb0] sm:$0xff]  ;;  %v666_v46 = vld [vmem:[#allocation2 + $0xb8] sm:$0xff]  ;;  %v2880_v5 = vadd.f32 %v2820_v25, %v661_v37  ;;  %v2883_v6 = vadd.f32 %v2820_v25, %v662_v38  ;;  %v2886_v7 = vadd.f32 %v2820_v25, %v663_v39  ;;  %vm745_vm6 = vcmp.gt.f32.partialorder %v2838_v43, 0.0 }
 0x290   : > { %v667_v51 = vld [vmem:[#allocation2 + $0xc0] sm:$0xff]  ;;  %v668_v52 = vld [vmem:[#allocation2 + $0xc8] sm:$0xff]  ;;  %v669_v53 = vld [vmem:[#allocation2 + $0xd0] sm:$0xff]  ;;  %v2889_v11 = vadd.f32 %v2820_v25, %v664_v44  ;;  %v2892_v12 = vadd.f32 %v2820_v25, %v665_v45  ;;  %v2895_v13 = vadd.f32 %v2820_v25, %v666_v46  ;;  %vm746_vm7 = vcmp.gt.f32.partialorder %v2841_v47, 0.0 }
 0x291   : > { %v670_v58 = vld [vmem:[#allocation2 + $0xd8] sm:$0xff]  ;;  %v671_v59 = vld [vmem:[#allocation2 + $0xe0] sm:$0xff]  ;;  %v672_v60 = vld [vmem:[#allocation2 + $0xe8] sm:$0xff]  ;;  %v2898_v14 = vadd.f32 %v2820_v25, %v667_v51  ;;  %v2901_v15 = vadd.f32 %v2820_v25, %v668_v52  ;;  %v2904_v16 = vadd.f32 %v2820_v25, %v669_v53  ;;  %vm747_vm8 = vcmp.gt.f32.partialorder %v2844_v48, 0.0 }
 0x292   : > { %v673_v1 = vld [vmem:[#allocation2 + $0xf0] sm:$0xff]  ;;  %v674_v2 = vld [vmem:[#allocation2 + $0xf8] sm:$0xff]  ;;  %v675_v3 = vld [vmem:[#allocation2 + $0x100] sm:$0xff]  ;;  %v2907_v17 = vadd.f32 %v2820_v25, %v670_v58  ;;  %v2910_v18 = vadd.f32 %v2820_v25, %v671_v59  ;;  %v2913_v19 = vadd.f32 %v2820_v25, %v672_v60  ;;  %vm748_vm9 = vcmp.gt.f32.partialorder %v2847_v49, 0.0 }
 0x293   : > { %v676_v8 = vld [vmem:[#allocation2 + $0x108] sm:$0xff]  ;;  %v677_v9 = vld [vmem:[#allocation2 + $0x110] sm:$0xff]  ;;  %v678_v10 = vld [vmem:[#allocation2 + $0x118] sm:$0xff]  ;;  %v2916_v21 = vadd.f32 %v2820_v25, %v673_v1  ;;  %v2919_v22 = vadd.f32 %v2820_v25, %v674_v2  ;;  %v2922_v23 = vadd.f32 %v2820_v25, %v675_v3  ;;  %vm749_vm10 = vcmp.gt.f32.partialorder %v2850_v50, 0.0 }
 0x294   : > { %v679_v24 = vld [vmem:[#allocation2 + $0x120] sm:$0xff]  ;;  %v2925_v26 = vadd.f32 %v2820_v25, %v676_v8  ;;  %v2928_v27 = vadd.f32 %v2820_v25, %v677_v9  ;;  %v2931_v28 = vadd.f32 %v2820_v25, %v678_v10  ;;  %v680_v29 = vld [vmem:[#allocation2 + $0x128] sm:$0xff]  ;;  %vm750_vm11 = vcmp.gt.f32.partialorder %v2853_v54, 0.0 }
 0x295   : > { %v2943_v30 = vadd.f32 %v2820_v25, %v679_v24  ;;  %v789_v31 = vmul.f32 0.2, %v2823_v35  ;;  %v790_v32 = vmul.f32 0.2, %v2829_v40  ;;  %v791_v33 = vmul.f32 0.2, %v2832_v41 }
 0x296   : > { %v2950_v34 = vadd.f32 %v2820_v25, %v680_v29  ;;  %vm751_vm12 = vcmp.gt.f32.partialorder %v2856_v55, 0.0  ;;  %v792_v37 = vmul.f32 0.2, %v2835_v42  ;;  %v793_v38 = vmul.f32 0.2, %v2838_v43 }
 0x297   : > { %v794_v39 = vmul.f32 0.2, %v2841_v47  ;;  %vm756_vm1 = vcmp.gt.f32.partialorder %v2871_v63, 0.0  ;;  %v795_v25 = vmul.f32 0.2, %v2844_v48  ;;  %v2967_v46 = vsel %vm741_vm2, %v2823_v35, %v789_v31 }
 0x298   : > { %v796_v44 = vmul.f32 0.2, %v2847_v49  ;;  %v797_v45 = vmul.f32 0.2, %v2850_v50  ;;  %vm760_vm0 = vcmp.gt.f32.partialorder %v2883_v6, 0.0  ;;  %v2979_v58 = vsel %vm742_vm3, %v2829_v40, %v790_v32 }
 0x299   : > { %v798_v51 = vmul.f32 0.2, %v2853_v54  ;;  %v799_v52 = vmul.f32 0.2, %v2856_v55  ;;  %v800_v53 = vmul.f32 0.2, %v2859_v56  ;;  %v2991_v1 = vsel %vm743_vm4, %v2832_v41, %v791_v33 }
 0x29a   : > { %vm764_vm15 = vcmp.gt.f32.partialorder %v2895_v13, 0.0  ;;  %v801_v35 = vmul.f32 0.2, %v2862_v57  ;;  %v802_v59 = vmul.f32 0.2, %v2865_v61  ;;  %4061 = vst [vmem:[#allocation12_spill] sm:$0xff] %v2991_v1  ;;  %v3003_v8 = vsel %vm744_vm5, %v2835_v42, %v792_v37 }
 0x29b   : > { %v803_v60 = vmul.f32 0.2, %v2868_v62  ;;  %vm768_vm14 = vcmp.gt.f32.partialorder %v2907_v17, 0.0  ;;  %v804_v40 = vmul.f32 0.2, %v2871_v63  ;;  %4062 = vst [vmem:[#allocation13_spill] sm:$0xff] %v3003_v8  ;;  %v3015_v24 = vsel %vm745_vm6, %v2838_v43, %v793_v38 }
 0x29c   : > { %v805_v2 = vmul.f32 0.2, %v2874_v0  ;;  %v806_v3 = vmul.f32 0.2, %v2877_v4  ;;  %vm772_vm13 = vcmp.gt.f32.partialorder %v2919_v22, 0.0  ;;  %4063 = vst [vmem:[#allocation14_spill] sm:$0xff] %v3015_v24  ;;  %v3027_v32 = vsel %vm746_vm7, %v2841_v47, %v794_v39 }
 0x29d   : > { %v807_v41 = vmul.f32 0.2, %v2880_v5  ;;  %v808_v9 = vmul.f32 0.2, %v2883_v6  ;;  %v809_v10 = vmul.f32 0.2, %v2886_v7  ;;  %v3037_v38 = vsel %vm747_vm8, %v2844_v48, %v795_v25 }
 0x29e   : > { %vm774_vm4 = vcmp.gt.f32.partialorder %v2925_v26, 0.0  ;;  %vm775_vm3 = vcmp.gt.f32.partialorder %v2928_v27, 0.0  ;;  %v810_v42 = vmul.f32 0.2, %v2889_v11  ;;  %v811_v29 = vmul.f32 0.2, %v2892_v12 }
 0x29f   : > { %v812_v31 = vmul.f32 0.2, %v2895_v13  ;;  %4064 = vst [vmem:[#allocation15_spill] sm:$0xff] %v3027_v32  ;;  %vm777_vm6 = vcmp.gt.f32.partialorder %v2943_v30, 0.0  ;;  %vm778_vm5 = vcmp.gt.f32.partialorder %v2950_v34, 0.0  ;;  %4065 = vst [vmem:[#allocation16_spill] sm:$0xff] %v3037_v38  ;;  %v3045_v32 = vsel %vm748_vm9, %v2847_v49, %v796_v44 }
 0x2a0   : > { %v813_v43 = vmul.f32 0.2, %v2898_v14  ;;  %v814_v33 = vmul.f32 0.2, %v2901_v15  ;;  %v815_v37 = vmul.f32 0.2, %v2904_v16  ;;  %v3054_v25 = vsel %vm749_vm10, %v2850_v50, %v797_v45 }
 0x2a1   : > { %vm1030_vm2 = vcmask 7168   ;;  %v816_v20 = vmul.f32 0.2, %v2907_v17  ;;  %v817_v47 = vmul.f32 0.2, %v2910_v18  ;;  %4066 = vst [vmem:[#allocation17_spill] sm:$0xff] %v3045_v32  ;;  %v3062_v44 = vsel %vm750_vm11, %v2853_v54, %v798_v51 }
 0x2a2   : > { %v818_v39 = vmul.f32 0.2, %v2913_v19  ;;  %vm971_vm7 = vcmp.lt.s32.totalorder %v2826_v36, 300  ;;  %v819_v24 = vmul.f32 0.2, %v2916_v21  ;;  %4067 = vst [vmem:[#allocation18_spill] sm:$0xff] %v3054_v25  ;;  %v3069_v50 = vsel %vm751_vm12, %v2856_v55, %v799_v52 }
 0x2a3   : > { %v820_v8 = vmul.f32 0.2, %v2919_v22  ;;  %v821_v48 = vmul.f32 0.2, %v2922_v23  ;;  %v822_v38 = vmul.f32 0.2, %v2925_v26 }
 0x2a4   : > { %v823_v1 = vmul.f32 0.2, %v2928_v27  ;;  %v824_v49 = vmul.f32 0.2, %v2931_v28  ;;  %v825_v32 = vmul.f32 0.2, %v2943_v30 }
 0x2a5   : > { %v826_v36 = vmul.f32 0.2, %v2950_v34  ;;  %vm4068_vm8 = vcmp.gt.f32.partialorder %v2859_v56, 0.0  ;;  %vm4069_vm9 = vcmp.gt.f32.partialorder %v2862_v57, 0.0  ;;  %vm4070_vm10 = vcmp.gt.f32.partialorder %v2865_v61, 0.0 }
 0x2a6   : > { %v3074_v45 = vsel %vm4068_vm8, %v2859_v56, %v800_v53  ;;  %v3079_v25 = vsel %vm4069_vm9, %v2862_v57, %v801_v35  ;;  %v3084_v54 = vsel %vm4070_vm10, %v2865_v61, %v802_v59  ;;  %vm4071_vm11 = vcmp.gt.f32.partialorder %v2868_v62, 0.0  ;;  %v4088_v35 = vld [vmem:[#allocation13_spill] sm:$0xff]  ;;  %v4089_v59 = vld [vmem:[#allocation14_spill] sm:$0xff] }
 0x2a7   : > { %v3089_v55 = vsel %vm4071_vm11, %v2868_v62, %v803_v60  ;;  %v3094_v56 = vsel %vm756_vm1, %v2871_v63, %v804_v40  ;;  %vm4072_vm12 = vcmp.gt.f32.partialorder %v2874_v0, 0.0  ;;  %vm4073_vm8 = vcmp.gt.f32.partialorder %v2877_v4, 0.0  ;;  %v4091_v40 = vld [vmem:[#allocation16_spill] sm:$0xff] }
 0x2a8   : > { %v3099_v57 = vsel %vm4072_vm12, %v2874_v0, %v805_v2  ;;  %v3104_v61 = vsel %vm4073_vm8, %v2877_v4, %v806_v3  ;;  %vm4074_vm9 = vcmp.gt.f32.partialorder %v2880_v5, 0.0  ;;  %v3114_v63 = vsel %vm760_vm0, %v2883_v6, %v808_v9  ;;  %v4092_v3 = vld [vmem:[#allocation17_spill] sm:$0xff] }
 0x2a9   : > { %v3109_v62 = vsel %vm4074_vm9, %v2880_v5, %v807_v41  ;;  %vm4075_vm1 = vcmp.gt.f32.partialorder %v2886_v7, 0.0  ;;  %vm4076_vm10 = vcmp.gt.f32.partialorder %v2889_v11, 0.0  ;;  %vm4077_vm11 = vcmp.gt.f32.partialorder %v2892_v12, 0.0 }
 0x2aa   : > { %v3119_v0 = vsel %vm4075_vm1, %v2886_v7, %v809_v10  ;;  %v3124_v4 = vsel %vm4076_vm10, %v2889_v11, %v810_v42  ;;  %v3129_v5 = vsel %vm4077_vm11, %v2892_v12, %v811_v29  ;;  %v3134_v6 = vsel %vm764_vm15, %v2895_v13, %v812_v31 }
 0x2ab   : > { %vm4078_vm0 = vcmp.gt.f32.partialorder %v2898_v14, 0.0  ;;  %vm4079_vm12 = vcmp.gt.f32.partialorder %v2901_v15, 0.0  ;;  %vm4080_vm8 = vcmp.gt.f32.partialorder %v2904_v16, 0.0  ;;  %v3154_v13 = vsel %vm768_vm14, %v2907_v17, %v816_v20 }
 0x2ac   : > { %v3139_v7 = vsel %vm4078_vm0, %v2898_v14, %v813_v43  ;;  %v3144_v11 = vsel %vm4079_vm12, %v2901_v15, %v814_v33  ;;  %v3149_v12 = vsel %vm4080_vm8, %v2904_v16, %v815_v37  ;;  %vm4081_vm15 = vcmp.gt.f32.partialorder %v2910_v18, 0.0 }
 0x2ad   : > { %v3159_v14 = vsel %vm4081_vm15, %v2910_v18, %v817_v47  ;;  %vm4082_vm9 = vcmp.gt.f32.partialorder %v2913_v19, 0.0  ;;  %vm4083_vm1 = vcmp.gt.f32.partialorder %v2916_v21, 0.0  ;;  %v3174_v20 = vsel %vm772_vm13, %v2919_v22, %v820_v8 }
 0x2ae   : > { %v3164_v15 = vsel %vm4082_vm9, %v2913_v19, %v818_v39  ;;  %v3169_v16 = vsel %vm4083_vm1, %v2916_v21, %v819_v24  ;;  %vm4084_vm14 = vcmp.gt.f32.partialorder %v2922_v23, 0.0  ;;  %v3184_v18 = vsel %vm774_vm4, %v2925_v26, %v822_v38  ;;  %v4093_v24 = vld [vmem:[#allocation18_spill] sm:$0xff] }
 0x2af   : > { %v3179_v17 = vsel %vm4084_vm14, %v2922_v23, %v821_v48  ;;  %v3189_v19 = vsel %vm775_vm3, %v2928_v27, %v823_v1  ;;  %vm4085_vm10 = vcmp.gt.f32.partialorder %v2931_v28, 0.0  ;;  %v3199_v22 = vsel %vm777_vm6, %v2943_v30, %v825_v32 }
 0x2b0   : > { %v3194_v21 = vsel %vm4085_vm10, %v2931_v28, %v824_v49  ;;  %v874_v23 = vsel %vm778_vm5, %v2950_v34, %v826_v36  ;;  %v1031_v26 = vsel %vm1030_vm2, %v2967_v46, -inf  ;;  %v1032_v27 = vsel %vm1030_vm2, %v2979_v58, -inf  ;;  %v4087_v28 = vld [vmem:[#allocation12_spill] sm:$0xff]  ;;  %v4090_v34 = vld [vmem:[#allocation15_spill] sm:$0xff] }
 0x2b1   : > { %v3210_v52 = vsel %vm971_vm7, %v874_v23, -inf  ;;  %v1033_v53 = vsel %vm1030_vm2, %v4087_v28, -inf  ;;  %v1034_v30 = vsel %vm1030_vm2, %v4088_v35, -inf  ;;  %v1035_v60 = vsel %vm1030_vm2, %v4089_v59, -inf }
 0x2b2   : > { %v1036_v36 = vmax.f32 %v1031_v26, %v1035_v60  ;;  %v1037_v1 = vsel %vm1030_vm2, %v4090_v34, -inf  ;;  %v1039_v2 = vsel %vm1030_vm2, %v4091_v40, -inf  ;;  %v1041_v8 = vsel %vm1030_vm2, %v4092_v3, -inf }
 0x2b3   : > { %v1038_v41 = vmax.f32 %v1032_v27, %v1037_v1  ;;  %v1040_v9 = vmax.f32 %v1033_v53, %v1039_v2  ;;  %v1042_v10 = vmax.f32 %v1034_v30, %v1041_v8  ;;  %v1043_v42 = vsel %vm1030_vm2, %v4093_v24, -inf }
 0x2b4   : > { %v1044_v29 = vmax.f32 %v1036_v36, %v1043_v42  ;;  %v1045_v31 = vsel %vm1030_vm2, %v3062_v44, -inf  ;;  %v1047_v32 = vsel %vm1030_vm2, %v3069_v50, -inf  ;;  %v1049_v43 = vsel %vm1030_vm2, %v3074_v45, -inf }
 0x2b5   : > { %v1046_v33 = vmax.f32 %v1038_v41, %v1045_v31  ;;  %v1048_v37 = vmax.f32 %v1040_v9, %v1047_v32  ;;  %v1050_v38 = vmax.f32 %v1042_v10, %v1049_v43  ;;  %v1051_v47 = vsel %vm1030_vm2, %v3079_v25, -inf }
 0x2b6   : > { %v1052_v39 = vmax.f32 %v1044_v29, %v1051_v47  ;;  %v1053_v48 = vsel %vm1030_vm2, %v3084_v54, -inf  ;;  %v1055_v49 = vsel %vm1030_vm2, %v3089_v55, -inf  ;;  %v1057_v23 = vsel %vm1030_vm2, %v3094_v56, -inf }
 0x2b7   : > { %v1054_v26 = vmax.f32 %v1046_v33, %v1053_v48  ;;  %v1056_v27 = vmax.f32 %v1048_v37, %v1055_v49  ;;  %v1058_v53 = vmax.f32 %v1050_v38, %v1057_v23  ;;  %v1059_v30 = vsel %vm1030_vm2, %v3099_v57, -inf }
 0x2b8   : > { %v1060_v60 = vmax.f32 %v1052_v39, %v1059_v30  ;;  %v1061_v36 = vsel %vm1030_vm2, %v3104_v61, -inf  ;;  %v1063_v1 = vsel %vm1030_vm2, %v3109_v62, -inf  ;;  %v1065_v2 = vsel %vm1030_vm2, %v3114_v63, -inf }
 0x2b9   : > { %v1062_v8 = vmax.f32 %v1054_v26, %v1061_v36  ;;  %v1064_v41 = vmax.f32 %v1056_v27, %v1063_v1  ;;  %v1066_v9 = vmax.f32 %v1058_v53, %v1065_v2  ;;  %v1067_v10 = vsel %vm1030_vm2, %v3119_v0, -inf }
 0x2ba   : > { %v1068_v42 = vmax.f32 %v1060_v60, %v1067_v10  ;;  %v1069_v29 = vsel %vm1030_vm2, %v3124_v4, -inf  ;;  %v1071_v31 = vsel %vm1030_vm2, %v3129_v5, -inf  ;;  %v1073_v32 = vsel %vm1030_vm2, %v3134_v6, -inf }
 0x2bb   : > { %v1070_v43 = vmax.f32 %v1062_v8, %v1069_v29  ;;  %v1072_v33 = vmax.f32 %v1064_v41, %v1071_v31  ;;  %v1074_v37 = vmax.f32 %v1066_v9, %v1073_v32  ;;  %v1075_v38 = vsel %vm1030_vm2, %v3139_v7, -inf }
 0x2bc   : > { %v1076_v47 = vmax.f32 %v1068_v42, %v1075_v38  ;;  %v1077_v39 = vsel %vm1030_vm2, %v3144_v11, -inf  ;;  %v1079_v48 = vsel %vm1030_vm2, %v3149_v12, -inf  ;;  %v1081_v49 = vsel %vm1030_vm2, %v3154_v13, -inf }
 0x2bd   : > { %v1078_v23 = vmax.f32 %v1070_v43, %v1077_v39  ;;  %v1080_v26 = vmax.f32 %v1072_v33, %v1079_v48  ;;  %v1082_v27 = vmax.f32 %v1074_v37, %v1081_v49  ;;  %v1083_v53 = vsel %vm1030_vm2, %v3159_v14, -inf }
 0x2be   : > { %v1084_v30 = vmax.f32 %v1076_v47, %v1083_v53  ;;  %v1085_v60 = vsel %vm1030_vm2, %v3164_v15, -inf  ;;  %v1087_v36 = vsel %vm1030_vm2, %v3169_v16, -inf  ;;  %v1089_v1 = vsel %vm1030_vm2, %v3174_v20, -inf }
 0x2bf   : > { %v1086_v2 = vmax.f32 %v1078_v23, %v1085_v60  ;;  %v1088_v8 = vmax.f32 %v1080_v26, %v1087_v36  ;;  %v1090_v41 = vmax.f32 %v1082_v27, %v1089_v1  ;;  %v1091_v9 = vsel %vm1030_vm2, %v3179_v17, -inf }
 0x2c0   : > { %v1092_v10 = vmax.f32 %v1084_v30, %v1091_v9  ;;  %v1093_v42 = vsel %vm1030_vm2, %v3184_v18, -inf  ;;  %v1095_v29 = vsel %vm1030_vm2, %v3189_v19, -inf  ;;  %v1097_v31 = vsel %vm1030_vm2, %v3194_v21, -inf }
 0x2c1   : > { %v1094_v32 = vmax.f32 %v1086_v2, %v1093_v42  ;;  %v1096_v43 = vmax.f32 %v1088_v8, %v1095_v29  ;;  %v1098_v33 = vmax.f32 %v1090_v41, %v1097_v31  ;;  %v1099_v37 = vsel %vm1030_vm2, %v3199_v22, -inf }
 0x2c2   : > { %v1100_v38 = vmax.f32 %v1092_v10, %v1099_v37  ;;  %v1101_v47 = vsel %vm1030_vm2, %v3210_v52, -inf }
 0x2c3   : > { %v1102_v39 = vmax.f32 %v1094_v32, %v1101_v47  ;;  %v1124_v48 = vmax.f32 %v1096_v43, %v1098_v33 }
 0x2c5   : > { %v1123_v49 = vmax.f32 %v1100_v38, %v1102_v39 }
 0x2c7   : > { %v1125_v23 = vmax.f32 %v1123_v49, %v1124_v48 }
 0x2c9   : > { %v1126_v26 = vrot.slane %v1125_v23, 4 }
 0x2cb   : > { %v1127_v27 = vmax.f32 %v1125_v23, %v1126_v26 }
 0x2cd   : > { %v1128_v53 = vrot.slane %v1127_v27, 2 }
 0x2cf   : > { %v1129_v30 = vmax.f32 %v1127_v27, %v1128_v53 }
 0x2d1   : > { %v1130_v60 = vrot.slane %v1129_v30, 1 }
 0x2d3   : > { %v3284_v36 = vmax.f32 %v1129_v30, %v1130_v60 }
 0x2d5   : > { %v1132_v1 = vsub.f32 %v2967_v46, %v3284_v36  ;;  %v1133_v2 = vsub.f32 %v2979_v58, %v3284_v36  ;;  %v1134_v8 = vsub.f32 %v4087_v28, %v3284_v36  ;;  %v1135_v41 = vsub.f32 %v4088_v35, %v3284_v36 }
 0x2d6   : > { %v1136_v9 = vsub.f32 %v4089_v59, %v3284_v36  ;;  %v1137_v10 = vsub.f32 %v4090_v34, %v3284_v36  ;;  %v1165_v42 = vsub.f32 %v3184_v18, %v3284_v36  ;;  %v1166_v46 = vsub.f32 %v3189_v19, %v3284_v36 }
 0x2d7   : > { %v1167_v58 = vsub.f32 %v3194_v21, %v3284_v36  ;;  %v1168_v28 = vsub.f32 %v3199_v22, %v3284_v36  ;;  %v1169_v35 = vsub.f32 %v3210_v52, %v3284_v36  ;;  %v1180_v29 = vmul.f32 1.442695, %v1132_v1 }
 0x2d8   : > { %v1138_v59 = vsub.f32 %v4091_v40, %v3284_v36  ;;  %v1182_v34 = vmul.f32 1.442695, %v1133_v2  ;;  %v1184_v31 = vmul.f32 1.442695, %v1134_v8  ;;  %v1186_v32 = vmul.f32 1.442695, %v1135_v41 }
 0x2d9   : > { %2432 = vpow2.f32 %v1180_v29  ;;  %v1188_v43 = vmul.f32 1.442695, %v1136_v9  ;;  %v1139_v33 = vsub.f32 %v4092_v3, %v3284_v36  ;;  %v1190_v37 = vmul.f32 1.442695, %v1137_v10 }
 0x2da   : > { %2434 = vpow2.f32 %v1182_v34  ;;  %v1140_v38 = vsub.f32 %v4093_v24, %v3284_v36  ;;  %v1192_v47 = vmul.f32 1.442695, %v1138_v59  ;;  %v1141_v40 = vsub.f32 %v3062_v44, %v3284_v36 }
 0x2db   : > { %2436 = vpow2.f32 %v1184_v31  ;;  %v1194_v39 = vmul.f32 1.442695, %v1139_v33  ;;  %v1142_v48 = vsub.f32 %v3069_v50, %v3284_v36  ;;  %v1143_v3 = vsub.f32 %v3074_v45, %v3284_v36 }
 0x2dc   : > { %2438 = vpow2.f32 %v1186_v32  ;;  %v1196_v49 = vmul.f32 1.442695, %v1140_v38  ;;  %v1198_v23 = vmul.f32 1.442695, %v1141_v40  ;;  %v1144_v27 = vsub.f32 %v3079_v25, %v3284_v36 }
 0x2dd   : > { %2440 = vpow2.f32 %v1188_v43  ;;  %v1200_v44 = vmul.f32 1.442695, %v1142_v48  ;;  %v1145_v30 = vsub.f32 %v3084_v54, %v3284_v36  ;;  %v1202_v1 = vmul.f32 1.442695, %v1143_v3 }
 0x2de   : > { %2442 = vpow2.f32 %v1190_v37  ;;  %v1146_v54 = vsub.f32 %v3089_v55, %v3284_v36  ;;  %v1204_v10 = vmul.f32 1.442695, %v1144_v27  ;;  %v1147_v31 = vsub.f32 %v3094_v56, %v3284_v36 }
 0x2df   : > { %2444 = vpow2.f32 %v1192_v47  ;;  %v1206_v32 = vmul.f32 1.442695, %v1145_v30  ;;  %v1148_v55 = vsub.f32 %v3099_v57, %v3284_v36  ;;  %v1149_v56 = vsub.f32 %v3104_v61, %v3284_v36 }
 0x2e0   : > { %2446 = vpow2.f32 %v1194_v39  ;;  %v1208_v38 = vmul.f32 1.442695, %v1146_v54  ;;  %v1210_v48 = vmul.f32 1.442695, %v1147_v31  ;;  %v1150_v57 = vsub.f32 %v3109_v62, %v3284_v36 }
 0x2e1   : > { %2448 = vpow2.f32 %v1196_v49  ;;  %v1212_v27 = vmul.f32 1.442695, %v1148_v55  ;;  %v1151_v61 = vsub.f32 %v3114_v63, %v3284_v36  ;;  %v1152_v62 = vsub.f32 %v3119_v0, %v3284_v36 }
 0x2e2   : > { %2450 = vpow2.f32 %v1198_v23  ;;  %v1153_v63 = vsub.f32 %v3124_v4, %v3284_v36  ;;  %v1154_v0 = vsub.f32 %v3129_v5, %v3284_v36  ;;  %v1155_v4 = vsub.f32 %v3134_v6, %v3284_v36 }
 0x2e3   : > { %v3320_v26 = vpop.eup %2432  ;;  %2452 = vpow2.f32 %v1200_v44  ;;  %v1156_v5 = vsub.f32 %v3139_v7, %v3284_v36  ;;  %v1157_v6 = vsub.f32 %v3144_v11, %v3284_v36  ;;  %v1158_v7 = vsub.f32 %v3149_v12, %v3284_v36 }
 0x2e4   : > { %v3322_v24 = vpop.eup %2434  ;;  %v1276_v53 = vsel %vm1030_vm2, %v3320_v26, 0.0  ;;  %2454 = vpow2.f32 %v1202_v1  ;;  %v1159_v11 = vsub.f32 %v3154_v13, %v3284_v36  ;;  %v1160_v12 = vsub.f32 %v3159_v14, %v3284_v36 }
 0x2e5   : > { %v3328_v50 = vpop.eup %2436  ;;  %v1277_v45 = vsel %vm1030_vm2, %v3322_v24, 0.0  ;;  %2456 = vpow2.f32 %v1204_v10  ;;  %v1161_v13 = vsub.f32 %v3164_v15, %v3284_v36  ;;  %v1162_v14 = vsub.f32 %v3169_v16, %v3284_v36 }
 0x2e6   : > { %v3334_v60 = vpop.eup %2438  ;;  %v1278_v2 = vadd.f32 %v1277_v45, %v1276_v53  ;;  %v1279_v25 = vsel %vm1030_vm2, %v3328_v50, 0.0  ;;  %2458 = vpow2.f32 %v1206_v32  ;;  %v1214_v45 = vmul.f32 1.442695, %v1149_v56 }
 0x2e7   : > { %v3338_v8 = vpop.eup %2440  ;;  %v1281_v41 = vsel %vm1030_vm2, %v3334_v60, 0.0  ;;  %2460 = vpow2.f32 %v1208_v38  ;;  %v1163_v15 = vsub.f32 %v3174_v20, %v3284_v36  ;;  %v1164_v16 = vsub.f32 %v3179_v17, %v3284_v36 }
 0x2e8   : > { %v3342_v9 = vpop.eup %2442  ;;  %v1280_v29 = vadd.f32 %v1279_v25, %v1278_v2  ;;  %v1283_v59 = vsel %vm1030_vm2, %v3338_v8, 0.0  ;;  %2462 = vpow2.f32 %v1210_v48  ;;  %v1250_v18 = vmul.f32 1.442695, %v1167_v58 }
 0x2e9   : > { %v3348_v34 = vpop.eup %2444  ;;  %v1285_v33 = vsel %vm1030_vm2, %v3342_v9, 0.0  ;;  %2464 = vpow2.f32 %v1212_v27  ;;  %v1242_v20 = vmul.f32 1.442695, %v1163_v15  ;;  %v1170_v19 = vsub.f32 -inf, %v3284_v36 }
 0x2ea   : > { %v1282_v43 = vadd.f32 %v1281_v41, %v1280_v29  ;;  %v3354_v37 = vpop.eup %2446  ;;  %v1287_v40 = vsel %vm1030_vm2, %v3348_v34, 0.0  ;;  %v1216_v41 = vmul.f32 1.442695, %v1150_v57  ;;  %2466 = vpow2.f32 %v1214_v45 }
 0x2eb   : > { %v3360_v39 = vpop.eup %2448  ;;  %v1289_v3 = vsel %vm1030_vm2, %v3354_v37, 0.0  ;;  %v1254_v21 = vmul.f32 1.442695, %v1169_v35  ;;  %v1256_v22 = vmul.f32 1.442695, %v1170_v19 }
 0x2ec   : > { %v1284_v47 = vadd.f32 %v1283_v59, %v1282_v43  ;;  %v3366_v23 = vpop.eup %2450  ;;  %v1291_v53 = vsel %vm1030_vm2, %v3360_v39, 0.0  ;;  %v1218_v59 = vmul.f32 1.442695, %v1151_v61  ;;  %2468 = vpow2.f32 %v1216_v41 }
 0x2ed   : > { %v3372_v30 = vpop.eup %2452  ;;  %v1293_v2 = vsel %vm1030_vm2, %v3366_v23, 0.0 }
 0x2ee   : > { %v1286_v49 = vadd.f32 %v1285_v33, %v1284_v47  ;;  %v3378_v25 = vpop.eup %2454  ;;  %v1295_v10 = vsel %vm1030_vm2, %v3372_v30, 0.0  ;;  %v1220_v33 = vmul.f32 1.442695, %v1152_v62  ;;  %2470 = vpow2.f32 %v1218_v59 }
 0x2ef   : > { %v3384_v29 = vpop.eup %2456  ;;  %v1297_v32 = vsel %vm1030_vm2, %v3378_v25, 0.0 }
 0x2f0   : > { %v1288_v44 = vadd.f32 %v1287_v40, %v1286_v49  ;;  %v3390_v43 = vpop.eup %2458  ;;  %v1299_v38 = vsel %vm1030_vm2, %v3384_v29, 0.0  ;;  %v1222_v40 = vmul.f32 1.442695, %v1153_v63  ;;  %2472 = vpow2.f32 %v1220_v33 }
 0x2f1   : > { %v3396_v47 = vpop.eup %2460  ;;  %v1301_v48 = vsel %vm1030_vm2, %v3390_v43, 0.0 }
 0x2f2   : > { %v1290_v1 = vadd.f32 %v1289_v3, %v1288_v44  ;;  %v3402_v49 = vpop.eup %2462  ;;  %v1224_v3 = vmul.f32 1.442695, %v1154_v0  ;;  %v1303_v27 = vsel %vm1030_vm2, %v3396_v47, 0.0  ;;  %2474 = vpow2.f32 %v1222_v40 }
 0x2f3   : > { %v3408_v44 = vpop.eup %2464  ;;  %v1305_v45 = vsel %vm1030_vm2, %v3402_v49, 0.0 }
 0x2f4   : > { %v1292_v54 = vadd.f32 %v1291_v53, %v1290_v1  ;;  %v1226_v53 = vmul.f32 1.442695, %v1155_v4  ;;  %v3414_v1 = vpop.eup %2466  ;;  %2476 = vpow2.f32 %v1224_v3  ;;  %v1307_v41 = vsel %vm1030_vm2, %v3408_v44, 0.0 }
 0x2f5   : > { %v1309_v59 = vsel %vm1030_vm2, %v3414_v1, 0.0 }
 0x2f6   : > { %v1294_v31 = vadd.f32 %v1293_v2, %v1292_v54  ;;  %v1228_v2 = vmul.f32 1.442695, %v1156_v5  ;;  %v3420_v54 = vpop.eup %2468  ;;  %2478 = vpow2.f32 %v1226_v53 }
 0x2f7   : > { %v1311_v33 = vsel %vm1030_vm2, %v3420_v54, 0.0 }
 0x2f8   : > { %v1296_v55 = vadd.f32 %v1295_v10, %v1294_v31  ;;  %v1230_v10 = vmul.f32 1.442695, %v1157_v6  ;;  %v3426_v31 = vpop.eup %2470  ;;  %2480 = vpow2.f32 %v1228_v2 }
 0x2f9   : > { %v1313_v40 = vsel %vm1030_vm2, %v3426_v31, 0.0 }
 0x2fa   : > { %v1298_v56 = vadd.f32 %v1297_v32, %v1296_v55  ;;  %v1232_v32 = vmul.f32 1.442695, %v1158_v7  ;;  %v3432_v55 = vpop.eup %2472  ;;  %2482 = vpow2.f32 %v1230_v10 }
 0x2fb   : > { %v1315_v3 = vsel %vm1030_vm2, %v3432_v55, 0.0 }
 0x2fc   : > { %v1300_v57 = vadd.f32 %v1299_v38, %v1298_v56  ;;  %v1234_v38 = vmul.f32 1.442695, %v1159_v11  ;;  %v3438_v56 = vpop.eup %2474  ;;  %2484 = vpow2.f32 %v1232_v32  ;;  %v1246_v32 = vmul.f32 1.442695, %v1165_v42 }
 0x2fd   : > { %v1317_v53 = vsel %vm1030_vm2, %v3438_v56, 0.0 }
 0x2fe   : > { %v1302_v61 = vadd.f32 %v1301_v48, %v1300_v57  ;;  %v1236_v48 = vmul.f32 1.442695, %v1160_v12  ;;  %v3444_v57 = vpop.eup %2476  ;;  %2486 = vpow2.f32 %v1234_v38  ;;  %v1248_v38 = vmul.f32 1.442695, %v1166_v46 }
 0x2ff   : > { %v1319_v2 = vsel %vm1030_vm2, %v3444_v57, 0.0  ;;  %v1252_v46 = vmul.f32 1.442695, %v1168_v28 }
 0x300   : > { %v1304_v62 = vadd.f32 %v1303_v27, %v1302_v61  ;;  %v1238_v27 = vmul.f32 1.442695, %v1161_v13  ;;  %v3450_v61 = vpop.eup %2478  ;;  %2488 = vpow2.f32 %v1236_v48 }
 0x301   : > { %v1321_v11 = vsel %vm1030_vm2, %v3450_v61, 0.0 }
 0x302   : > { %v1306_v63 = vadd.f32 %v1305_v45, %v1304_v62  ;;  %v1240_v45 = vmul.f32 1.442695, %v1162_v14  ;;  %v3456_v62 = vpop.eup %2480  ;;  %2490 = vpow2.f32 %v1238_v27 }
 0x303   : > { %v1323_v17 = vsel %vm1030_vm2, %v3456_v62, 0.0 }
 0x304   : > { %v1308_v0 = vadd.f32 %v1307_v41, %v1306_v63  ;;  %v3460_v10 = vpop.eup %2482  ;;  %2492 = vpow2.f32 %v1240_v45  ;;  %v1244_v63 = vmul.f32 1.442695, %v1164_v16 }
 0x305   : > { %2494 = vpow2.f32 %v1242_v20 }
 0x306   : > { %v1310_v4 = vadd.f32 %v1309_v59, %v1308_v0  ;;  %v3464_v12 = vpop.eup %2484  ;;  %2496 = vpow2.f32 %v1244_v63 }
 0x307   : > { %2498 = vpow2.f32 %v1246_v32 }
 0x308   : > { %v1312_v5 = vadd.f32 %v1311_v33, %v1310_v4  ;;  %v1325_v33 = vsel %vm1030_vm2, %v3460_v10, 0.0  ;;  %v3471_v13 = vpop.eup %2486  ;;  %2500 = vpow2.f32 %v1248_v38 }
 0x309   : > { %v1329_v48 = vsel %vm1030_vm2, %v3471_v13, 0.0  ;;  %2502 = vpow2.f32 %v1250_v18 }
 0x30a   : > { %v1314_v6 = vadd.f32 %v1313_v40, %v1312_v5  ;;  %v1327_v40 = vsel %vm1030_vm2, %v3464_v12, 0.0  ;;  %v3478_v14 = vpop.eup %2488  ;;  %2504 = vpow2.f32 %v1252_v46 }
 0x30b   : > { %v1331_v15 = vsel %vm1030_vm2, %v3478_v14, 0.0  ;;  %2506 = vpow2.f32 %v1254_v21 }
 0x30c   : > { %v1316_v7 = vadd.f32 %v1315_v3, %v1314_v6  ;;  %v3485_v5 = vpop.eup %2490  ;;  %2508 = vpow2.f32 %v1256_v22 }
 0x30d   : > { %v1333_v6 = vsel %vm1030_vm2, %v3485_v5, 0.0 }
 0x30e   : > { %v1318_v41 = vadd.f32 %v1317_v53, %v1316_v7  ;;  %v3493_v27 = vpop.eup %2492 }
 0x30f   : > { %v3500_v53 = vpop.eup %2494  ;;  %v1335_v16 = vsel %vm1030_vm2, %v3493_v27, 0.0 }
 0x310   : > { %v1320_v59 = vadd.f32 %v1319_v2, %v1318_v41  ;;  %v3504_v45 = vpop.eup %2496  ;;  %v1337_v52 = vsel %vm1030_vm2, %v3500_v53, 0.0 }
 0x311   : > { %v3508_v36 = vpop.eup %2498  ;;  %v1339_v2 = vsel %vm1030_vm2, %v3504_v45, 0.0 }
 0x312   : > { %v1322_v0 = vadd.f32 %v1321_v11, %v1320_v59  ;;  %v3512_v20 = vpop.eup %2500  ;;  %v1341_v11 = vsel %vm1030_vm2, %v3508_v36, 0.0 }
 0x313   : > { %v3516_v63 = vpop.eup %2502 }
 0x314   : > { %v1324_v4 = vadd.f32 %v1323_v17, %v1322_v0  ;;  %v1343_v17 = vsel %vm1030_vm2, %v3512_v20, 0.0  ;;  %v3520_v32 = vpop.eup %2504 }
 0x315   : > { %v3524_v38 = vpop.eup %2506 }
 0x316   : > { %v1326_v42 = vadd.f32 %v1325_v33, %v1324_v4  ;;  %v1345_v33 = vsel %vm1030_vm2, %v3516_v63, 0.0  ;;  %v2509_v18 = vpop.eup %2508 }
 0x317   : > { %v1351_v46 = vsel %vm1030_vm2, %v2509_v18, 0.0 }
 0x318   : > { %v1328_v3 = vadd.f32 %v1327_v40, %v1326_v42  ;;  %v1347_v40 = vsel %vm1030_vm2, %v3520_v32, 0.0 }
 0x31a   : > { %v1330_v58 = vadd.f32 %v1329_v48, %v1328_v3  ;;  %v1349_v48 = vsel %vm1030_vm2, %v3524_v38, 0.0 }
 0x31c   : > { %v1332_v28 = vadd.f32 %v1331_v15, %v1330_v58 }
 0x31e   : > { %v1334_v7 = vadd.f32 %v1333_v6, %v1332_v28 }
 0x320   : > { %v1336_v35 = vadd.f32 %v1335_v16, %v1334_v7 }
 0x322   : > { %v1338_v41 = vadd.f32 %v1337_v52, %v1336_v35 }
 0x324   : > { %v1340_v59 = vadd.f32 %v1339_v2, %v1338_v41 }
 0x326   : > { %v1342_v0 = vadd.f32 %v1341_v11, %v1340_v59 }
 0x328   : > { %v1344_v4 = vadd.f32 %v1343_v17, %v1342_v0 }
 0x32a   : > { %v1346_v42 = vadd.f32 %v1345_v33, %v1344_v4 }
 0x32c   : > { %v1348_v19 = vadd.f32 %v1347_v40, %v1346_v42 }
 0x32e   : > { %v1350_v3 = vadd.f32 %v1349_v48, %v1348_v19 }
 0x330   : > { %v1352_v15 = vadd.f32 %v1351_v46, %v1350_v3 }
 0x332   : > { %v1354_v21 = vadd.f32 %v1352_v15, %v1351_v46 }
 0x334   : > { %v1356_v58 = vadd.f32 %v1354_v21, %v1351_v46 }
 0x336   : > { %v1358_v6 = vadd.f32 %v1356_v58, %v1351_v46 }
 0x338   : > { %v1360_v22 = vadd.f32 %v1358_v6, %v1351_v46 }
 0x33a   : > { %v1362_v28 = vadd.f32 %v1360_v22, %v1351_v46 }
 0x33c   : > { %v1364_v16 = vadd.f32 %v1362_v28, %v1351_v46 }
 0x33e   : > { %v1366_v7 = vadd.f32 %v1364_v16, %v1351_v46 }
 0x340   : > { %v1368_v52 = vadd.f32 %v1366_v7, %v1351_v46 }
 0x342   : > { %v1370_v35 = vadd.f32 %v1368_v52, %v1351_v46 }
 0x344   : > { %v1371_v2 = vrot.slane %v1370_v35, 4 }
 0x346   : > { %v1372_v41 = vadd.f32 %v1371_v2, %v1370_v35  ;;  %v1426_v2 = vld [vmem:[#allocation7] sm:$0xff] }
 0x348   : > { %v1373_v11 = vrot.slane %v1372_v41, 2 }
 0x34a   : > { %v1374_v59 = vadd.f32 %v1373_v11, %v1372_v41  ;;  %v1431_v41 = vld [vmem:[#allocation7 + $0x28] sm:$0xff]  ;;  %v1430_v11 = vld [vmem:[#allocation7 + $0x20] sm:$0xff] }
 0x34c   : > { %v1375_v17 = vrot.slane %v1374_v59, 1 }
 0x34e   : > { %v1376_v0 = vadd.f32 %v1375_v17, %v1374_v59 }
 0x350   : > { %2510 = vrcp.f32 %v1376_v0 }
 0x35a   : > { %v3531_v33 = vpop.eup %2510 }
 0x35b   : > { %v1380_v4 = vmul.f32 %v3531_v33, %v3328_v50  ;;  %v1378_v40 = vmul.f32 %v3531_v33, %v3320_v26  ;;  %v1381_v18 = vmul.f32 %v3531_v33, %v3334_v60  ;;  %v1379_v42 = vmul.f32 %v3531_v33, %v3322_v24 }
 0x35c   : > { %v1383_v48 = vmul.f32 %v3531_v33, %v3342_v9  ;;  %v1382_v19 = vmul.f32 %v3531_v33, %v3338_v8  ;;  %v1385_v26 = vmul.f32 %v3531_v33, %v3354_v37  ;;  %v1384_v50 = vmul.f32 %v3531_v33, %v3348_v34 }
 0x35d   : > { %1486 = vperm.xlu1 %2431, %v1380_v4   ;;  %1476 = vperm.xlu0 %2430, %v1378_v40   ;;  %v1387_v24 = vmul.f32 %v3531_v33, %v3366_v23  ;;  %v1386_v60 = vmul.f32 %v3531_v33, %v3360_v39  ;;  %v1389_v8 = vmul.f32 %v3531_v33, %v3378_v25  ;;  %v1433_v4 = vld [vmem:[#allocation7 + $0x38] sm:$0xff]  ;;  %v1428_v40 = vld [vmem:[#allocation7 + $0x10] sm:$0xff] }
 0x35e   : > { %v1388_v9 = vmul.f32 %v3531_v33, %v3372_v30  ;;  %v1391_v34 = vmul.f32 %v3531_v33, %v3390_v43  ;;  %v1390_v37 = vmul.f32 %v3531_v33, %v3384_v29  ;;  %v1393_v39 = vmul.f32 %v3531_v33, %v3402_v49 }
 0x35f   : > { %v1392_v23 = vmul.f32 %v3531_v33, %v3396_v47  ;;  %v1395_v30 = vmul.f32 %v3531_v33, %v3414_v1  ;;  %v1394_v25 = vmul.f32 %v3531_v33, %v3408_v44  ;;  %v1397_v29 = vmul.f32 %v3531_v33, %v3426_v31 }
 0x360   : > { %v1396_v43 = vmul.f32 %v3531_v33, %v3420_v54  ;;  %v1399_v47 = vmul.f32 %v3531_v33, %v3438_v56  ;;  %v1398_v49 = vmul.f32 %v3531_v33, %v3432_v55  ;;  %v1401_v44 = vmul.f32 %v3531_v33, %v3450_v61 }
 0x361   : > { %1491 = vperm.xlu1 %2431, %v1381_v18   ;;  %1481 = vperm.xlu0 %2430, %v1379_v42   ;;  %v1400_v1 = vmul.f32 %v3531_v33, %v3444_v57  ;;  %v1403_v54 = vmul.f32 %v3531_v33, %v3460_v10  ;;  %v1402_v31 = vmul.f32 %v3531_v33, %v3456_v62  ;;  %v3622_v18 = vld [vmem:[%s4040_s3] ss:$0 sm:$0xff] }
 0x362   : > { %v1405_v55 = vmul.f32 %v3531_v33, %v3471_v13  ;;  %v1404_v56 = vmul.f32 %v3531_v33, %v3464_v12  ;;  %v1407_v57 = vmul.f32 %v3531_v33, %v3485_v5  ;;  %v1406_v61 = vmul.f32 %v3531_v33, %v3478_v14 }
 0x363   : > { %v1409_v62 = vmul.f32 %v3531_v33, %v3500_v53  ;;  %v1408_v10 = vmul.f32 %v3531_v33, %v3493_v27  ;;  %v1411_v12 = vmul.f32 %v3531_v33, %v3508_v36  ;;  %v1410_v13 = vmul.f32 %v3531_v33, %v3504_v45 }
 0x364   : > { %v1413_v14 = vmul.f32 %v3531_v33, %v3516_v63  ;;  %v1412_v5 = vmul.f32 %v3531_v33, %v3512_v20  ;;  %v1414_v27 = vmul.f32 %v3531_v33, %v3520_v32  ;;  %v1415_v53 = vmul.f32 %v3531_v33, %v3524_v38  ;;  %v1427_v33 = vld [vmem:[#allocation7 + $0x8] sm:$0xff] }
 0x365   : > { %1501 = vperm.xlu1 %2431, %v1383_v48   ;;  %1496 = vperm.xlu0 %2430, %v1382_v19   ;;  %v1432_v48 = vld [vmem:[#allocation7 + $0x30] sm:$0xff]  ;;  %v1429_v19 = vld [vmem:[#allocation7 + $0x18] sm:$0xff] }
 0x369   : > { %1511 = vperm.xlu1 %2431, %v1385_v26   ;;  %1506 = vperm.xlu0 %2430, %v1384_v50   ;;  %v1435_v50 = vld [vmem:[#allocation7 + $0x48] sm:$0xff] }
 0x36d   : > { %1521 = vperm.xlu1 %2431, %v1387_v24   ;;  %1516 = vperm.xlu0 %2430, %v1386_v60  }
 0x371   : > { %1531 = vperm.xlu1 %2431, %v1389_v8   ;;  %1526 = vperm.xlu0 %2430, %v1388_v9   ;;  %v1434_v8 = vld [vmem:[#allocation7 + $0x40] sm:$0xff] }
 0x375   : > { %1541 = vperm.xlu1 %2431, %v1391_v34   ;;  %1536 = vperm.xlu0 %2430, %v1390_v37  }
 0x379   : > { %1551 = vperm.xlu1 %2431, %v1393_v39   ;;  %1546 = vperm.xlu0 %2430, %v1392_v23   ;;  %v4094_v39 = vld [vmem:[#allocation10_spill] sm:$0xff] }
 0x37a   : > { %v1915_v23 = vsub.s32 0, %v4094_v39 }
 0x37d   : > { %1561 = vperm.xlu1 %2431, %v1395_v30   ;;  %1556 = vperm.xlu0 %2430, %v1394_v25  }
 0x381   : > { %1571 = vperm.xlu1 %2431, %v1397_v29   ;;  %1566 = vperm.xlu0 %2430, %v1396_v43   ;;  %v1437_v29 = vld [vmem:[#allocation7 + $0x58] sm:$0xff] }
 0x385   : > { %1581 = vperm.xlu1 %2431, %v1399_v47   ;;  %1576 = vperm.xlu0 %2430, %v1398_v49  }
 0x389   : > { %1591 = vperm.xlu1 %2431, %v1401_v44   ;;  %1586 = vperm.xlu0 %2430, %v1400_v1   ;;  %v1436_v44 = vld [vmem:[#allocation7 + $0x50] sm:$0xff] }
 0x38d   : > { %1601 = vperm.xlu1 %2431, %v1403_v54   ;;  %1596 = vperm.xlu0 %2430, %v1402_v31   ;;  %v1439_v31 = vld [vmem:[#allocation7 + $0x68] sm:$0xff] }
 0x391   : > { %1611 = vperm.xlu1 %2431, %v1405_v55   ;;  %1606 = vperm.xlu0 %2430, %v1404_v56  }
 0x395   : > { %1621 = vperm.xlu1 %2431, %v1407_v57   ;;  %1616 = vperm.xlu0 %2430, %v1406_v61   ;;  %v1438_v61 = vld [vmem:[#allocation7 + $0x60] sm:$0xff] }
 0x399   : > { %1631 = vperm.xlu1 %2431, %v1409_v62   ;;  %1626 = vperm.xlu0 %2430, %v1408_v10  }
 0x39d   : > { %1641 = vperm.xlu1 %2431, %v1411_v12   ;;  %1636 = vperm.xlu0 %2430, %v1410_v13  }
 0x3a1   : > { %1651 = vperm.xlu1 %2431, %v1413_v14   ;;  %1646 = vperm.xlu0 %2430, %v1412_v5  }
 0x3a5   : > { %1656 = vperm.xlu1 %2431, %v1414_v27   ;;  %1661 = vperm.xlu0 %2430, %v1415_v53   ;;  %v1441_v27 = vld [vmem:[#allocation7 + $0x78] sm:$0xff] }
 0x3dc   : > { %v1487_v36 = vpop.permute.xlu1 %1486  ;;  %v1477_v45 = vpop.permute.xlu0 %1476 }
 0x3dd   : > { %v1714_v0 = vmul.f32 %v1477_v45, %v1426_v2  ;;  %v1716_v37 = vmul.f32 %v1487_v36, %v1428_v40  ;;  %v1442_v2 = vld [vmem:[#allocation7 + $0x80] sm:$0xff]  ;;  %v1445_v40 = vld [vmem:[#allocation7 + $0x98] sm:$0xff] }
 0x3df   : > { %v3630_v30 = vadd.f32 %v3622_v18, %v1714_v0  ;;  %v3649_v12 = vadd.f32 %v3622_v18, %v1716_v37 }
 0x3e0   : > { %v1492_v46 = vpop.permute.xlu1 %1491  ;;  %v1482_v3 = vpop.permute.xlu0 %1481 }
 0x3e1   : > { %v1715_v24 = vmul.f32 %v1482_v3, %v1427_v33  ;;  %v1717_v43 = vmul.f32 %v1492_v46, %v1429_v19  ;;  %v3652_v13 = vrot.slane %v3630_v30, %v1915_v23  ;;  %v1440_v3 = vld [vmem:[#allocation7 + $0x70] sm:$0xff] }
 0x3e3   : > { %v3639_v55 = vadd.f32 %v3622_v18, %v1715_v24  ;;  %v3658_v53 = vadd.f32 %v3622_v18, %v1717_v43 }
 0x3e4   : > { %v1502_v15 = vpop.permute.xlu1 %1501  ;;  %v1497_v21 = vpop.permute.xlu0 %1496 }
 0x3e5   : > { %v1719_v42 = vmul.f32 %v1502_v15, %v1431_v41  ;;  %v1718_v26 = vmul.f32 %v1497_v21, %v1430_v11 }
 0x3e7   : > { %v3633_v47 = vadd.f32 %v3622_v18, %v1719_v42  ;;  %v3636_v1 = vadd.f32 %v3622_v18, %v1718_v26  ;;  %v1444_v26 = vld [vmem:[#allocation7 + $0x90] sm:$0xff] }
 0x3e8   : > { %v1512_v63 = vpop.permute.xlu1 %1511  ;;  %v1507_v58 = vpop.permute.xlu0 %1506 }
 0x3e9   : > { %v1721_v60 = vmul.f32 %v1512_v63, %v1433_v4  ;;  %v1720_v25 = vmul.f32 %v1507_v58, %v1432_v48  ;;  %v1966_v36 = vmin.f32 %v3639_v55, %v3633_v47  ;;  %v2019_v15 = vmax.f32 %v3639_v55, %v3633_v47 }
 0x3ea   : > { %v1965_v21 = vmin.f32 %v3630_v30, %v3636_v1 }
 0x3eb   : > { %v3642_v56 = vadd.f32 %v3622_v18, %v1721_v60  ;;  %v3655_v14 = vadd.f32 %v3622_v18, %v1720_v25  ;;  %v1446_v25 = vld [vmem:[#allocation7 + $0xa0] sm:$0xff] }
 0x3ec   : > { %v1522_v6 = vpop.permute.xlu1 %1521  ;;  %v1517_v20 = vpop.permute.xlu0 %1516 }
 0x3ed   : > { %v1723_v49 = vmul.f32 %v1522_v6, %v1435_v50  ;;  %v1722_v54 = vmul.f32 %v1517_v20, %v1434_v8  ;;  %v1443_v6 = vld [vmem:[#allocation7 + $0x88] sm:$0xff]  ;;  %v2018_v20 = vmax.f32 %v3630_v30, %v3636_v1  ;;  %v2021_v0 = vmax.f32 %v3658_v53, %v3642_v56 }
 0x3ee   : > { %v2020_v42 = vmax.f32 %v3649_v12, %v3655_v14  ;;  %v1447_v8 = vld [vmem:[#allocation7 + $0xa8] sm:$0xff] }
 0x3ef   : > { %v3663_v45 = vadd.f32 %v3622_v18, %v1723_v49  ;;  %v3670_v63 = vadd.f32 %v3622_v18, %v1722_v54 }
 0x3f0   : > { %v1532_v22 = vpop.permute.xlu1 %1531  ;;  %v1527_v28 = vpop.permute.xlu0 %1526 }
 0x3f1   : > { %v1725_v57 = vmul.f32 %v1532_v22, %v1437_v29  ;;  %v1724_v5 = vmul.f32 %v1527_v28, %v1436_v44  ;;  %v1968_v22 = vmin.f32 %v3658_v53, %v3642_v56  ;;  %v2023_v50 = vmax.f32 %v2019_v15, %v3663_v45  ;;  %v1451_v15 = vld [vmem:[#allocation7 + $0xc8] sm:$0xff] }
 0x3f2   : > { %v1969_v24 = vmin.f32 %v1965_v21, %v3670_v63  ;;  %v2022_v37 = vmax.f32 %v2018_v20, %v3670_v63 }
 0x3f3   : > { %v3677_v28 = vadd.f32 %v3622_v18, %v1725_v57  ;;  %v3684_v33 = vadd.f32 %v3622_v18, %v1724_v5  ;;  %v1449_v5 = vld [vmem:[#allocation7 + $0xb8] sm:$0xff] }
 0x3f4   : > { %v1542_v16 = vpop.permute.xlu1 %1541  ;;  %v1537_v7 = vpop.permute.xlu0 %1536 }
 0x3f5   : > { %v1727_v46 = vmul.f32 %v1542_v16, %v1439_v31  ;;  %v1726_v58 = vmul.f32 %v1537_v7, %v1438_v61  ;;  %v1967_v7 = vmin.f32 %v3649_v12, %v3655_v14  ;;  %v1972_v39 = vmin.f32 %v1968_v22, %v3677_v28 }
 0x3f6   : > { %v2025_v49 = vmax.f32 %v2021_v0, %v3677_v28  ;;  %v2024_v31 = vmax.f32 %v2020_v42, %v3684_v33 }
 0x3f7   : > { %v3691_v48 = vadd.f32 %v3622_v18, %v1727_v46  ;;  %v3697_v60 = vadd.f32 %v3622_v18, %v1726_v58  ;;  %v1971_v44 = vmin.f32 %v1967_v7, %v3684_v33  ;;  %v1450_v7 = vld [vmem:[#allocation7 + $0xc0] sm:$0xff] }
 0x3f8   : > { %v1552_v32 = vpop.permute.xlu1 %1551  ;;  %v3609_v52 = vpop.permute.xlu0 %1546 }
 0x3f9   : > { %v1729_v16 = vmul.f32 %v1552_v32, %v1441_v27  ;;  %v1728_v4 = vmul.f32 %v3609_v52, %v1440_v3  ;;  %v1970_v32 = vmin.f32 %v1966_v36, %v3663_v45  ;;  %v2027_v27 = vmax.f32 %v2023_v50, %v3691_v48 }
 0x3fa   : > { %v1973_v36 = vmin.f32 %v1969_v24, %v3697_v60  ;;  %v2026_v21 = vmax.f32 %v2022_v37, %v3697_v60 }
 0x3fb   : > { %v3703_v23 = vadd.f32 %v3622_v18, %v1729_v16  ;;  %v3709_v54 = vadd.f32 %v3622_v18, %v1728_v4  ;;  %v1974_v57 = vmin.f32 %v1970_v32, %v3691_v48  ;;  %v1453_v4 = vld [vmem:[#allocation7 + $0xd8] sm:$0xff] }
 0x3fc   : > { %v3611_v38 = vpop.permute.xlu1 %1561  ;;  %v3613_v35 = vpop.permute.xlu0 %1556 }
 0x3fd   : > { %v1731_v19 = vmul.f32 %v3611_v38, %v1443_v6  ;;  %v1730_v52 = vmul.f32 %v3613_v35, %v1442_v2  ;;  %v1976_v58 = vmin.f32 %v1972_v39, %v3703_v23  ;;  %v2029_v6 = vmax.f32 %v2025_v49, %v3703_v23  ;;  %v1454_v49 = vld [vmem:[#allocation7 + $0xe0] sm:$0xff] }
 0x3fe   : > { %v1975_v16 = vmin.f32 %v1971_v44, %v3709_v54  ;;  %v2028_v2 = vmax.f32 %v2024_v31, %v3709_v54 }
 0x3ff   : > { %v3715_v61 = vadd.f32 %v3622_v18, %v1731_v19  ;;  %v3721_v46 = vadd.f32 %v3622_v18, %v1730_v52 }
 0x400   : > { %v3615_v59 = vpop.permute.xlu1 %1571  ;;  %v3617_v17 = vpop.permute.xlu0 %1566 }
 0x401   : > { %v1733_v38 = vmul.f32 %v3615_v59, %v1445_v40  ;;  %v1732_v35 = vmul.f32 %v3617_v17, %v1444_v26  ;;  %v1448_v17 = vld [vmem:[#allocation7 + $0xb0] sm:$0xff]  ;;  %v1978_v40 = vmin.f32 %v1974_v57, %v3715_v61  ;;  %v2031_v50 = vmax.f32 %v2027_v27, %v3715_v61 }
 0x402   : > { %v1452_v26 = vld [vmem:[#allocation7 + $0xd0] sm:$0xff]  ;;  %v1977_v24 = vmin.f32 %v1973_v36, %v3721_v46  ;;  %v2030_v52 = vmax.f32 %v2026_v21, %v3721_v46 }
 0x403   : > { %v3733_v0 = vadd.f32 %v3622_v18, %v1732_v35 }
 0x404   : > { %v3624_v9 = vpop.permute.xlu1 %1581  ;;  %v3626_v34 = vpop.permute.xlu0 %1576 }
 0x405   : > { %v1735_v59 = vmul.f32 %v3624_v9, %v1447_v8  ;;  %v1734_v3 = vmul.f32 %v3626_v34, %v1446_v25  ;;  %v3728_v9 = vadd.f32 %v3622_v18, %v1733_v38  ;;  %v1979_v35 = vmin.f32 %v1975_v16, %v3733_v0 }
 0x406   : > { %v2032_v31 = vmax.f32 %v2028_v2, %v3733_v0 }
 0x407   : > { %v3738_v42 = vadd.f32 %v3622_v18, %v1735_v59  ;;  %v3745_v8 = vadd.f32 %v3622_v18, %v1734_v3  ;;  %v1980_v37 = vmin.f32 %v1976_v58, %v3728_v9  ;;  %v2033_v39 = vmax.f32 %v2029_v6, %v3728_v9  ;;  %v1459_v3 = vld [vmem:[#allocation7 + $0x108] sm:$0xff] }
 0x408   : > { %v3644_v62 = vpop.permute.xlu1 %1591  ;;  %v3646_v10 = vpop.permute.xlu0 %1586 }
 0x409   : > { %v1737_v34 = vmul.f32 %v3644_v62, %v1449_v5  ;;  %v1736_v32 = vmul.f32 %v3646_v10, %v1448_v17  ;;  %v1455_v62 = vld [vmem:[#allocation7 + $0xe8] sm:$0xff]  ;;  %v1457_v10 = vld [vmem:[#allocation7 + $0xf8] sm:$0xff]  ;;  %v1456_v5 = vld [vmem:[#allocation7 + $0xf0] sm:$0xff]  ;;  %v1982_v27 = vmin.f32 %v1978_v40, %v3738_v42  ;;  %v2035_v17 = vmax.f32 %v2031_v50, %v3738_v42 }
 0x40a   : > { %v2034_v6 = vmax.f32 %v2030_v52, %v3745_v8 }
 0x40b   : > { %v3752_v57 = vadd.f32 %v3622_v18, %v1737_v34  ;;  %v3756_v36 = vadd.f32 %v3622_v18, %v1736_v32 }
 0x40c   : > { %v1602_v41 = vpop.permute.xlu1 %1601  ;;  %v1597_v11 = vpop.permute.xlu0 %1596 }
 0x40d   : > { %v1739_v19 = vmul.f32 %v1602_v41, %v1451_v15  ;;  %v1738_v38 = vmul.f32 %v1597_v11, %v1450_v7  ;;  %v1981_v15 = vmin.f32 %v1977_v24, %v3745_v8  ;;  %v1458_v7 = vld [vmem:[#allocation7 + $0x100] sm:$0xff]  ;;  %v2037_v40 = vmax.f32 %v2033_v39, %v3752_v57 }
 0x40f   : > { %v3759_v11 = vadd.f32 %v3622_v18, %v1739_v19  ;;  %v1983_v19 = vmin.f32 %v1979_v35, %v3756_v36 }
 0x410   : > { %v1612_v29 = vpop.permute.xlu1 %1611  ;;  %v1607_v43 = vpop.permute.xlu0 %1606 }
 0x411   : > { %v1741_v25 = vmul.f32 %v1612_v29, %v1453_v4  ;;  %v1740_v59 = vmul.f32 %v1607_v43, %v1452_v26  ;;  %v3765_v43 = vadd.f32 %v3622_v18, %v1738_v38  ;;  %v2036_v26 = vmax.f32 %v2032_v31, %v3756_v36  ;;  %v1461_v38 = vld [vmem:[#allocation7 + $0x118] sm:$0xff] }
 0x412   : > { %v1986_v50 = vmin.f32 %v1982_v27, %v3759_v11  ;;  %v2039_v52 = vmax.f32 %v2035_v17, %v3759_v11 }
 0x413   : > { %v3768_v16 = vadd.f32 %v3622_v18, %v1741_v25  ;;  %v3773_v32 = vadd.f32 %v3622_v18, %v1740_v59  ;;  %v1460_v25 = vld [vmem:[#allocation7 + $0x110] sm:$0xff] }
 0x414   : > { %v1622_v20 = vpop.permute.xlu1 %1621  ;;  %v1617_v22 = vpop.permute.xlu0 %1616 }
 0x415   : > { %v1743_v29 = vmul.f32 %v1622_v20, %v1455_v62  ;;  %v1742_v21 = vmul.f32 %v1617_v22, %v1454_v49  ;;  %v1984_v20 = vmin.f32 %v1980_v37, %v3752_v57  ;;  %v1985_v49 = vmin.f32 %v1981_v15, %v3765_v43 }
 0x416   : > { %v2041_v59 = vmax.f32 %v2037_v40, %v3768_v16  ;;  %v2040_v27 = vmax.f32 %v2036_v26, %v3773_v32 }
 0x417   : > { %v3779_v24 = vadd.f32 %v3622_v18, %v1743_v29  ;;  %v3783_v62 = vadd.f32 %v3622_v18, %v1742_v21 }
 0x418   : > { %v1632_v41 = vpop.permute.xlu1 %1631  ;;  %v1627_v44 = vpop.permute.xlu0 %1626 }
 0x419   : > { %v1745_v58 = vmul.f32 %v1632_v41, %v1457_v10  ;;  %v1744_v2 = vmul.f32 %v1627_v44, %v1456_v5  ;;  %v2038_v10 = vmax.f32 %v2034_v6, %v3765_v43  ;;  %v1988_v41 = vmin.f32 %v1984_v20, %v3768_v16  ;;  %v1463_v6 = vld [vmem:[#allocation7 + $0x128] sm:$0xff] }
 0x41a   : > { %v1987_v5 = vmin.f32 %v1983_v19, %v3773_v32  ;;  %v2043_v17 = vmax.f32 %v2039_v52, %v3779_v24 }
 0x41b   : > { %v3786_v37 = vadd.f32 %v3622_v18, %v1745_v58  ;;  %v3792_v44 = vadd.f32 %v3622_v18, %v1744_v2  ;;  %v1462_v58 = vld [vmem:[#allocation7 + $0x120] sm:$0xff]  ;;  %v1989_v2 = vmin.f32 %v1985_v49, %v3783_v62  ;;  %v2042_v52 = vmax.f32 %v2038_v10, %v3783_v62 }
 0x41c   : > { %v1642_v34 = vpop.permute.xlu1 %1641  ;;  %v1637_v4 = vpop.permute.xlu0 %1636 }
 0x41d   : > { %v1747_v22 = vmul.f32 %v1642_v34, %v1459_v3  ;;  %v1746_v39 = vmul.f32 %v1637_v4, %v1458_v7  ;;  %v1990_v3 = vmin.f32 %v1986_v50, %v3779_v24  ;;  %v1992_v34 = vmin.f32 %v1988_v41, %v3786_v37 }
 0x41e   : > { %v2045_v7 = vmax.f32 %v2041_v59, %v3786_v37  ;;  %v1991_v20 = vmin.f32 %v1987_v5, %v3792_v44  ;;  %v2044_v40 = vmax.f32 %v2040_v27, %v3792_v44 }
 0x41f   : > { %v3798_v29 = vadd.f32 %v3622_v18, %v1747_v22  ;;  %v3806_v4 = vadd.f32 %v3622_v18, %v1746_v39 }
 0x420   : > { %v1652_v35 = vpop.permute.xlu1 %1651  ;;  %v1647_v31 = vpop.permute.xlu0 %1646 }
 0x421   : > { %v1749_v15 = vmul.f32 %v1652_v35, %v1461_v38  ;;  %v1748_v21 = vmul.f32 %v1647_v31, %v1460_v25  ;;  %v1994_v38 = vmin.f32 %v1990_v3, %v3798_v29  ;;  %v1993_v59 = vmin.f32 %v1989_v2, %v3806_v4 }
 0x422   : > { %v2046_v5 = vmax.f32 %v2042_v52, %v3806_v4 }
 0x423   : > { %v3811_v22 = vadd.f32 %v3622_v18, %v1749_v15  ;;  %v3814_v19 = vadd.f32 %v3622_v18, %v1748_v21 }
 0x424   : > { %v1657_v26 = vpop.permute.xlu1 %1656  ;;  %v1662_v50 = vpop.permute.xlu0 %1661 }
 0x425   : > { %v1750_v25 = vmul.f32 %v1657_v26, %v1462_v58  ;;  %v1751_v49 = vmul.f32 %v1662_v50, %v1463_v6  ;;  %v1996_v39 = vmin.f32 %v1992_v34, %v3811_v22  ;;  %v2049_v41 = vmax.f32 %v2045_v7, %v3811_v22 }
 0x426   : > { %v1995_v35 = vmin.f32 %v1991_v20, %v3814_v19  ;;  %v2048_v31 = vmax.f32 %v2044_v40, %v3814_v19  ;;  %v2047_v6 = vmax.f32 %v2043_v17, %v3798_v29 }
 0x427   : > { %v3825_v27 = vadd.f32 %v3622_v18, %v1750_v25  ;;  %v1806_v10 = vadd.f32 %v3622_v18, %v1751_v49  ;;  %v2000_v3 = vmin.f32 %v1996_v39, %v3652_v13  ;;  %v2053_v15 = vmax.f32 %v2049_v41, %v3652_v13 }
 0x428   : > { %v1999_v21 = vmin.f32 %v1995_v35, %v3652_v13  ;;  %v2052_v58 = vmax.f32 %v2048_v31, %v3652_v13 }
 0x429   : > { %4095 = vst [vmem:[#allocation11_spill] sm:$0xff] %v3825_v27  ;;  %v1997_v34 = vmin.f32 %v1993_v59, %v3825_v27  ;;  %v2050_v2 = vmax.f32 %v2046_v5, %v3825_v27  ;;  %v3838_v7 = vsel %vm971_vm7, %v1806_v10, %v3652_v13  ;;  %v2004_v18 = vmin.f32 %v2000_v3, %v3652_v13 }
 0x42a   : > { %4096 = vst [vmem:[#allocation12_spill] sm:$0xff] %v3838_v7  ;;  %v2057_v20 = vmax.f32 %v2053_v15, %v3652_v13  ;;  %v2003_v40 = vmin.f32 %v1999_v21, %v3652_v13  ;;  %v2056_v26 = vmax.f32 %v2052_v58, %v3652_v13  ;;  %v1998_v52 = vmin.f32 %v1994_v38, %v3838_v7 }
 0x42b   : > { %v2001_v50 = vmin.f32 %v1997_v34, %v3652_v13  ;;  %v2054_v17 = vmax.f32 %v2050_v2, %v3652_v13  ;;  %v2051_v25 = vmax.f32 %v2047_v6, %v3838_v7  ;;  %v2008_v51 = vmin.f32 %v2004_v18, %v3652_v13 }
 0x42c   : > { %v2061_v49 = vmax.f32 %v2057_v20, %v3652_v13  ;;  %v2007_v39 = vmin.f32 %v2003_v40, %v3652_v13  ;;  %v2060_v41 = vmax.f32 %v2056_v26, %v3652_v13  ;;  %v2002_v59 = vmin.f32 %v1998_v52, %v3652_v13 }
 0x42d   : > { %v2005_v35 = vmin.f32 %v2001_v50, %v3652_v13  ;;  %v2058_v31 = vmax.f32 %v2054_v17, %v3652_v13  ;;  %v2055_v5 = vmax.f32 %v2051_v25, %v3652_v13 }
 0x42e   : > { %v2006_v38 = vmin.f32 %v2002_v59, %v3652_v13  ;;  %v2010_v3 = vmin.f32 %v2007_v39, %v2008_v51  ;;  %v2063_v15 = vmax.f32 %v2060_v41, %v2061_v49 }
 0x42f   : > { %v2059_v10 = vmax.f32 %v2055_v5, %v3652_v13 }
 0x430   : > { %v2009_v21 = vmin.f32 %v2005_v35, %v2006_v38 }
 0x431   : > { %v2062_v58 = vmax.f32 %v2058_v31, %v2059_v10 }
 0x432   : > { %v2011_v6 = vmin.f32 %v2009_v21, %v2010_v3  ;;  %v4098_v3 = vld [vmem:[#allocation12_spill] sm:$0xff] }
 0x433   : > { %v2064_v34 = vmax.f32 %v2062_v58, %v2063_v15 }
 0x434   : > { %v2012_v2 = vrot.slane %v2011_v6, 4 }
 0x435   : > { %v2065_v18 = vrot.slane %v2064_v34, 4 }
 0x436   : > { %v2013_v20 = vmin.f32 %v2011_v6, %v2012_v2 }
 0x437   : > { %v2066_v40 = vmax.f32 %v2064_v34, %v2065_v18 }
 0x438   : > { %v2014_v26 = vrot.slane %v2013_v20, 2 }
 0x439   : > { %v2067_v50 = vrot.slane %v2066_v40, 2 }
 0x43a   : > { %v2015_v17 = vmin.f32 %v2013_v20, %v2014_v26 }
 0x43b   : > { %v2068_v52 = vmax.f32 %v2066_v40, %v2067_v50 }
 0x43c   : > { %v2016_v7 = vrot.slane %v2015_v17, 1 }
 0x43d   : > { %v2069_v25 = vrot.slane %v2068_v52, 1 }
 0x43e   : > { %v3858_v27 = vmin.f32 %v2015_v17, %v2016_v7 }
 0x43f   : > { %v2070_v59 = vmax.f32 %v2068_v52, %v2069_v25 }
 0x440   : > { %v2071_v39 = vsub.f32 %v3630_v30, %v3858_v27  ;;  %v2072_v41 = vsub.f32 %v3639_v55, %v3858_v27  ;;  %v2073_v35 = vsub.f32 %v3649_v12, %v3858_v27  ;;  %v2074_v31 = vsub.f32 %v3658_v53, %v3858_v27 }
 0x441   : > { %v2119_v51 = vsub.f32 %v2070_v59, %v3858_v27  ;;  %v2075_v7 = vsub.f32 %v3636_v1, %v3858_v27  ;;  %v2076_v5 = vsub.f32 %v3633_v47, %v3858_v27  ;;  %v2077_v38 = vsub.f32 %v3655_v14, %v3858_v27 }
 0x442   : > { %v2078_v30 = vsub.f32 %v3642_v56, %v3858_v27  ;;  %v2079_v55 = vsub.f32 %v3670_v63, %v3858_v27  ;;  %v2080_v12 = vsub.f32 %v3663_v45, %v3858_v27  ;;  %v2081_v53 = vsub.f32 %v3684_v33, %v3858_v27 }
 0x443   : > { %v2120_v49 = vadd.f32 1e-06, %v2119_v51  ;;  %v2082_v1 = vsub.f32 %v3677_v28, %v3858_v27  ;;  %v2083_v47 = vsub.f32 %v3697_v60, %v3858_v27  ;;  %v2084_v14 = vsub.f32 %v3691_v48, %v3858_v27 }
 0x444   : > { %v2085_v56 = vsub.f32 %v3709_v54, %v3858_v27  ;;  %v2086_v63 = vsub.f32 %v3703_v23, %v3858_v27  ;;  %v2087_v45 = vsub.f32 %v3721_v46, %v3858_v27  ;;  %v2088_v33 = vsub.f32 %v3715_v61, %v3858_v27 }
 0x445   : > { %2512 = vrcp.f32 %v2120_v49  ;;  %v2089_v28 = vsub.f32 %v3733_v0, %v3858_v27  ;;  %v2090_v60 = vsub.f32 %v3728_v9, %v3858_v27  ;;  %v2091_v48 = vsub.f32 %v3745_v8, %v3858_v27 }
 0x446   : > { %v2092_v54 = vsub.f32 %v3738_v42, %v3858_v27  ;;  %v2093_v23 = vsub.f32 %v3756_v36, %v3858_v27  ;;  %v2094_v46 = vsub.f32 %v3752_v57, %v3858_v27  ;;  %v2095_v61 = vsub.f32 %v3765_v43, %v3858_v27 }
 0x447   : > { %v2096_v0 = vsub.f32 %v3759_v11, %v3858_v27  ;;  %v2097_v9 = vsub.f32 %v3773_v32, %v3858_v27  ;;  %v2098_v8 = vsub.f32 %v3768_v16, %v3858_v27  ;;  %v2099_v42 = vsub.f32 %v3783_v62, %v3858_v27  ;;  %v4097_v62 = vld [vmem:[#allocation11_spill] sm:$0xff] }
 0x448   : > { %v2100_v36 = vsub.f32 %v3779_v24, %v3858_v27  ;;  %v2101_v57 = vsub.f32 %v3792_v44, %v3858_v27  ;;  %v2102_v43 = vsub.f32 %v3786_v37, %v3858_v27  ;;  %v2103_v11 = vsub.f32 %v3806_v4, %v3858_v27 }
 0x449   : > { %v2104_v32 = vsub.f32 %v3798_v29, %v3858_v27  ;;  %v2105_v16 = vsub.f32 %v3814_v19, %v3858_v27  ;;  %v2106_v24 = vsub.f32 %v3811_v22, %v3858_v27  ;;  %v2107_v44 = vsub.f32 %v4097_v62, %v3858_v27 }
 0x44a   : > { %v2108_v37 = vsub.f32 %v4098_v3, %v3858_v27  ;;  %v2109_v15 = vsub.f32 %v3652_v13, %v3858_v27 }
 0x44f   : > { %v3931_v10 = vpop.eup %2512 }
 0x450   : > { %v2122_v21 = vmul.f32 %v3931_v10, %v2071_v39  ;;  %v2123_v58 = vmul.f32 %v3931_v10, %v2072_v41  ;;  %v2124_v6 = vmul.f32 %v3931_v10, %v2073_v35  ;;  %v2125_v34 = vmul.f32 %v3931_v10, %v2074_v31 }
 0x451   : > { %v2126_v2 = vmul.f32 %v3931_v10, %v2075_v7  ;;  %v2127_v18 = vmul.f32 %v3931_v10, %v2076_v5  ;;  %v2128_v20 = vmul.f32 %v3931_v10, %v2077_v38  ;;  %v2129_v40 = vmul.f32 %v3931_v10, %v2078_v30 }
 0x452   : > { %v2130_v26 = vmul.f32 %v3931_v10, %v2079_v55  ;;  %v2131_v50 = vmul.f32 %v3931_v10, %v2080_v12  ;;  %v2132_v17 = vmul.f32 %v3931_v10, %v2081_v53  ;;  %v2133_v52 = vmul.f32 %v3931_v10, %v2082_v1  ;;  %2170 = vst [vmem:[#allocation7] sm:$0xff] %v2122_v21 }
 0x453   : > { %2171 = vst [vmem:[#allocation7 + $0x8] sm:$0xff] %v2123_v58  ;;  %2172 = vst [vmem:[#allocation7 + $0x10] sm:$0xff] %v2124_v6  ;;  %v2134_v25 = vmul.f32 %v3931_v10, %v2083_v47  ;;  %v2135_v59 = vmul.f32 %v3931_v10, %v2084_v14  ;;  %v2136_v51 = vmul.f32 %v3931_v10, %v2085_v56 }
 0x454   : > { %2173 = vst [vmem:[#allocation7 + $0x18] sm:$0xff] %v2125_v34  ;;  %v2137_v49 = vmul.f32 %v3931_v10, %v2086_v63  ;;  %2174 = vst [vmem:[#allocation7 + $0x20] sm:$0xff] %v2126_v2  ;;  %v2138_v39 = vmul.f32 %v3931_v10, %v2087_v45  ;;  %v2139_v41 = vmul.f32 %v3931_v10, %v2088_v33 }
 0x455   : > { %2175 = vst [vmem:[#allocation7 + $0x28] sm:$0xff] %v2127_v18  ;;  %2176 = vst [vmem:[#allocation7 + $0x30] sm:$0xff] %v2128_v20  ;;  %v2140_v35 = vmul.f32 %v3931_v10, %v2089_v28  ;;  %v2141_v31 = vmul.f32 %v3931_v10, %v2090_v60  ;;  %v2142_v7 = vmul.f32 %v3931_v10, %v2091_v48 }
 0x456   : > { %2177 = vst [vmem:[#allocation7 + $0x38] sm:$0xff] %v2129_v40  ;;  %2178 = vst [vmem:[#allocation7 + $0x40] sm:$0xff] %v2130_v26  ;;  %v2143_v5 = vmul.f32 %v3931_v10, %v2092_v54  ;;  %v2144_v38 = vmul.f32 %v3931_v10, %v2093_v23  ;;  %v2145_v30 = vmul.f32 %v3931_v10, %v2094_v46 }
 0x457   : > { %2179 = vst [vmem:[#allocation7 + $0x48] sm:$0xff] %v2131_v50  ;;  %2180 = vst [vmem:[#allocation7 + $0x50] sm:$0xff] %v2132_v17  ;;  %v2146_v55 = vmul.f32 %v3931_v10, %v2095_v61  ;;  %v2147_v12 = vmul.f32 %v3931_v10, %v2096_v0  ;;  %v2148_v53 = vmul.f32 %v3931_v10, %v2097_v9 }
 0x458   : > { %2181 = vst [vmem:[#allocation7 + $0x58] sm:$0xff] %v2133_v52  ;;  %2182 = vst [vmem:[#allocation7 + $0x60] sm:$0xff] %v2134_v25  ;;  %v2149_v1 = vmul.f32 %v3931_v10, %v2098_v8  ;;  %v2150_v47 = vmul.f32 %v3931_v10, %v2099_v42  ;;  %v2151_v14 = vmul.f32 %v3931_v10, %v2100_v36 }
 0x459   : > { %2183 = vst [vmem:[#allocation7 + $0x68] sm:$0xff] %v2135_v59  ;;  %2184 = vst [vmem:[#allocation7 + $0x70] sm:$0xff] %v2136_v51  ;;  %v2152_v56 = vmul.f32 %v3931_v10, %v2101_v57  ;;  %v2153_v63 = vmul.f32 %v3931_v10, %v2102_v43  ;;  %v2154_v45 = vmul.f32 %v3931_v10, %v2103_v11 }
 0x45a   : > { %2185 = vst [vmem:[#allocation7 + $0x78] sm:$0xff] %v2137_v49  ;;  %2186 = vst [vmem:[#allocation7 + $0x80] sm:$0xff] %v2138_v39  ;;  %v2155_v33 = vmul.f32 %v3931_v10, %v2104_v32  ;;  %v2156_v28 = vmul.f32 %v3931_v10, %v2105_v16  ;;  %v2157_v60 = vmul.f32 %v3931_v10, %v2106_v24 }
 0x45b   : > { %2187 = vst [vmem:[#allocation7 + $0x88] sm:$0xff] %v2139_v41  ;;  %2188 = vst [vmem:[#allocation7 + $0x90] sm:$0xff] %v2140_v35  ;;  %v2158_v29 = vmul.f32 %v3931_v10, %v2107_v44  ;;  %v2159_v4 = vmul.f32 %v3931_v10, %v2108_v37  ;;  %v2160_v22 = vmul.f32 %v3931_v10, %v2109_v15 }
 0x45c   : > { %2189 = vst [vmem:[#allocation7 + $0x98] sm:$0xff] %v2141_v31  ;;  %2190 = vst [vmem:[#allocation7 + $0xa0] sm:$0xff] %v2142_v7 }
 0x45d   : > { %2191 = vst [vmem:[#allocation7 + $0xa8] sm:$0xff] %v2143_v5  ;;  %2192 = vst [vmem:[#allocation7 + $0xb0] sm:$0xff] %v2144_v38 }
 0x45e   : > { %2193 = vst [vmem:[#allocation7 + $0xb8] sm:$0xff] %v2145_v30  ;;  %2194 = vst [vmem:[#allocation7 + $0xc0] sm:$0xff] %v2146_v55 }
 0x45f   : > { %2195 = vst [vmem:[#allocation7 + $0xc8] sm:$0xff] %v2147_v12  ;;  %2196 = vst [vmem:[#allocation7 + $0xd0] sm:$0xff] %v2148_v53 }
 0x460   : > { %2197 = vst [vmem:[#allocation7 + $0xd8] sm:$0xff] %v2149_v1  ;;  %2198 = vst [vmem:[#allocation7 + $0xe0] sm:$0xff] %v2150_v47 }
 0x461   : > { %2199 = vst [vmem:[#allocation7 + $0xe8] sm:$0xff] %v2151_v14  ;;  %2200 = vst [vmem:[#allocation7 + $0xf0] sm:$0xff] %v2152_v56 }
 0x462   : > { %2201 = vst [vmem:[#allocation7 + $0xf8] sm:$0xff] %v2153_v63  ;;  %2202 = vst [vmem:[#allocation7 + $0x100] sm:$0xff] %v2154_v45 }
 0x463   : > { %2203 = vst [vmem:[#allocation7 + $0x108] sm:$0xff] %v2155_v33  ;;  %2204 = vst [vmem:[#allocation7 + $0x110] sm:$0xff] %v2156_v28 }
 0x464   : > { %2205 = vst [vmem:[#allocation7 + $0x118] sm:$0xff] %v2157_v60  ;;  %2206 = vst [vmem:[#allocation7 + $0x120] sm:$0xff] %v2158_v29 }
 0x465   : > { %2207 = vst [vmem:[#allocation7 + $0x128] sm:$0xff] %v2159_v4  ;;  %2208 = vst [vmem:[#allocation7 + $0x130] sm:$0xff] %v2160_v22 }
 0x466   : > { %2209 = vst [vmem:[#allocation7 + $0x138] sm:$0xff] %v2160_v22  ;;  %2210 = vst [vmem:[#allocation7 + $0x140] sm:$0xff] %v2160_v22 }
 0x467   : > { %2211 = vst [vmem:[#allocation7 + $0x148] sm:$0xff] %v2160_v22  ;;  %2212 = vst [vmem:[#allocation7 + $0x150] sm:$0xff] %v2160_v22 }
 0x468   : > { %2213 = vst [vmem:[#allocation7 + $0x158] sm:$0xff] %v2160_v22  ;;  %2214 = vst [vmem:[#allocation7 + $0x160] sm:$0xff] %v2160_v22 }
 0x469   : > { %2215 = vst [vmem:[#allocation7 + $0x168] sm:$0xff] %v2160_v22  ;;  %2216 = vst [vmem:[#allocation7 + $0x170] sm:$0xff] %v2160_v22 }
 0x46a   : > { %2217 = vst [vmem:[#allocation7 + $0x178] sm:$0xff] %v2160_v22 }
 0x46b PF: > { %p2374_p8 = scmp.eq.s32.totalorder %s2671_s4, 2  ;;  %s2616_s9 = smov [#allocation7]  }
 0x46c   : > { %s2224_s23 = sshll.u32 %s2616_s9, 4  ;;  %s2225_s23 = int_to_ptr.vmem [resolvable:$true] %s2224_s23 }
 0x46d   : > { %s2544_s11 = scalar_lea.vmem %s2225_s23, 6144  ;;  %p2551_p6 = scmp.lt.s32.totalorder %s2225_s23, %s2225_s23 }
 0x46e   : > { %p2545_p3 = scmp.ne.s32.totalorder %s2225_s23, %s2544_s11  ;;  %p2552_p9 = scmp.lt.s32.totalorder %s2544_s11, %s2544_s11 }
 0x470   : > { %p2546_p4 = pnand %p2545_p3, %p2374_p8  ;;  %p2553_p11 = por %p2552_p9, %p2551_p6 }
 0x472   : > { %p2547_p5 = pneg %p2546_p4 }
 0x474   : > { %p2554_p13 = pnand %p2553_p11, %p2547_p5 }
 0x476   : > { %2557 = shalt.err (!%p2554_p13)
}
 0x477   : > { %s2558_s28 = scalar_lea.hbm %s4042_s5, 6144 }
 0x478   : > { %p2559_p0 = scmp.ne.s32.totalorder %s4042_s5, %s2558_s28  ;;  %p2564_p12 = scmp.lt.u32.totalorder %s2558_s28, %s4042_s5 }
 0x47a   : > { %p2560_p1 = pnand %p2559_p0, %p2374_p8 }
 0x47c   : > { %p2561_p10 = pneg %p2560_p1 }
 0x47e   : > { %p2566_p2 = pnand %p2564_p12, %p2561_p10 }
 0x480   : > { %2569 = shalt.err (!%p2566_p2)
}
 0x481   : > { %s2617_s25 = smov 128   ;;  %s2618_s26 = smov 8  }
 0x482   : > { %2366 = dma.vmem_to_hbm [thread:$0]  (%p2374_p8), %s2225_s23, 6144, %s4042_s5, [#allocation6], %s2617_s25, %s2617_s25, %s2618_s26  }
 0x483   : > { %2591 = dma.done.wait (%p2374_p8), [#allocation6], 6144  }
 0x484   : > { %2593 = vsyncadd (%p2374_p8), [#allocation6], 4294961152 }
 0x485 PF: > { %p17_p7 = scmp.ge.s32.totalorder %s2674_s24, 5   ;;  %s4099_s20 = smov %s2600_s21 }
 0x486   : > { %s4100_s21 = smov %s2604_s22  ;;  %s4101_s22 = smov %s2684_s27 }
 0x487   : > { %s4102_s23 = smov %s2674_s24  ;;  %19 = sbr.rel (!%p17_p7) target bundleno = 6 (0x6), region = 83 }
 0x48e   :  { %2240 = vsyncpa [#allocation5], 1 }
 0x48f   :  { %2242 = vsyncpa [#allocation5 + $0x1], 1 }
 0x490   :  { %2243 = vsyncpa [#allocation6], 1 }
 0x491   :  { %2245 = vsyncpa [#allocation6 + $0x1], 1 }

</bundles_post_ra>
